<compile_context>
chip_gen: v7x
topology: tpu7x:2x2x1
jax: 0.10.0
libtpu: 0.0.40
codegen_flags: <defaults>
</compile_context>

<pallas_src>
import jax
import jax.numpy as jnp
from jax.experimental import pallas as pl
from jax.experimental.pallas import tpu as pltpu

# ----------------------------- configuration ------------------------------
EMBED_DIM = 768       # BERT CLS / ResNet+fc embedding dim
REDUCED_DIM = 30      # text_reducer / img_reducer output dim
HIDDEN_DIM1 = 64      # FLAGS.hidden_dim1 (synthetic)
HIDDEN_DIM2 = 32      # FLAGS.hidden_dim2 (synthetic)
NUM_CLASSES = 2
OUT_PAD = 128         # lane-aligned output width
NEG_FILL = -1e30      # bias fill for padded logits lanes -> softmax mass 0


# ------------------------------ helpers ------------------------------------
def _feature_layout(kinds):
    """Row offsets into the concatenated feature vector (torch.cat order)."""
    numeric_rows, embed_rows, embed_kinds = [], [], []
    off = 0
    for k in kinds:
        if k == "numeric":
            numeric_rows.append(off)
            off += 1
        elif k in ("text", "image"):
            embed_rows.append(list(range(off, off + REDUCED_DIM)))
            embed_kinds.append(k)
            off += REDUCED_DIM
        else:
            raise ValueError(f"unknown feature kind: {k}")
    return numeric_rows, embed_rows, tuple(embed_kinds), off


# ------------------------------ fused kernel -------------------------------
def build_forward(kinds, batch_tile=128):
    """Build a batched fused forward specialized to a static feature layout."""
    numeric_rows, _, embed_kinds, _ = _feature_layout(kinds)
    n_num = len(numeric_rows)
    n_emb = len(embed_kinds)
    assert n_num >= 1 and n_emb >= 1, "demo layout needs both kinds"
    TB = int(batch_tile)
    assert TB % 8 == 0, "batch tile must be sublane-aligned (multiple of 8)"

    def kernel(alpha_ref, num_ref, emb_ref,
               wt_ref, bt_ref, wi_ref, bi_ref,
               w1n_ref, w1e_ref, b1_ref,
               w2_ref, b2_ref, w3_ref, b3_ref,
               wl_ref, bl_ref, o_ref):
        f32 = jnp.float32

        # layer1 pre-activation without ever materializing the concat:
        #   x_concat @ W1 + b1
        # = numeric @ W1[numeric_rows]
        #   + sum_e relu(emb_e @ W_red_e + b_red_e) @ W1[rows_e]  + b1
        pre1 = jnp.dot(num_ref[...], w1n_ref[...],
                       preferred_element_type=f32) + b1_ref[...]     # (TB, H1)
        for e, kind in enumerate(embed_kinds):
            x_e = emb_ref[e]                                          # (TB, 768)
            if kind == "text":
                red = jnp.maximum(
                    jnp.dot(x_e, wt_ref[...], preferred_element_type=f32)
                    + bt_ref[...], 0.0)
            else:
                red = jnp.maximum(
                    jnp.dot(x_e, wi_ref[...], preferred_element_type=f32)
                    + bi_ref[...], 0.0)
            pre1 = pre1 + jnp.dot(red, w1e_ref[e],
                                  preferred_element_type=f32)         # (TB, H1)

        def prelu(v, a):
            return jnp.maximum(v, 0.0) + a * jnp.minimum(v, 0.0)

        h1 = prelu(pre1, alpha_ref[0])
        h2 = prelu(jnp.dot(h1, w2_ref[...], preferred_element_type=f32)
                   + b2_ref[...], alpha_ref[1])
        h3 = prelu(jnp.dot(h2, w3_ref[...], preferred_element_type=f32)
                   + b3_ref[...], alpha_ref[2])

        # logits padded to 128 lanes (pad cols: weight 0, bias -1e30 -> exp 0)
        logits = (jnp.dot(h3, wl_ref[...], preferred_element_type=f32)
                  + bl_ref[...])                                      # (TB, 128)
        m = jnp.max(logits, axis=-1, keepdims=True)
        ex = jnp.exp(logits - m)
        denom = jnp.sum(ex, axis=-1, keepdims=True)
        o_ref[...] = ex / denom          # exact softmax (torch parity)

    def _resident(arr):
        # whole-array block, pinned to block (0,...) on every grid step:
        # Pallas sees an unchanged block index and never re-DMAs the weight.
        nd = arr.ndim
        return pl.BlockSpec(arr.shape, lambda i, _nd=nd: (0,) * _nd)

    def forward(numeric, emb_stack, kp):
        B = numeric.shape[0]
        bp = ((B + TB - 1) // TB) * TB
        if bp != B:                       # pad batch to a tile multiple
            numeric = jnp.pad(numeric, ((0, bp - B), (0, 0)))
            emb_stack = jnp.pad(emb_stack, ((0, 0), (0, bp - B), (0, 0)))

        weights = (kp["wt"], kp["bt"], kp["wi"], kp["bi"],
                   kp["w1n"], kp["w1e"], kp["b1"],
                   kp["w2"], kp["b2"], kp["w3"], kp["b3"],
                   kp["wl_pad"], kp["bl_pad"])
        args = (kp["alphas"], numeric, emb_stack) + weights

        in_specs = [
            pl.BlockSpec(memory_space=pltpu.MemorySpace.SMEM),          # alphas
            pl.BlockSpec((TB, n_num), lambda i: (i, 0)),                # numeric
            pl.BlockSpec((n_emb, TB, EMBED_DIM), lambda i: (0, i, 0)),  # embeddings
        ] + [_resident(w) for w in weights]                             # resident

        probs_pad = pl.pallas_call(
            kernel,
            out_shape=jax.ShapeDtypeStruct((bp, OUT_PAD), jnp.float32),
            grid=(bp // TB,),
            in_specs=in_specs,
            out_specs=pl.BlockSpec((TB, OUT_PAD), lambda i: (i, 0)),
            compiler_params=pltpu.CompilerParams(
                dimension_semantics=("parallel",)),
        )(*args)
        return probs_pad[:B, :NUM_CLASSES]

    return forward


# ------------------------- parameter initialization ------------------------
def _linear_init(key, fan_in, fan_out):
    """torch.nn.Linear default init: U(-1/sqrt(fan_in), 1/sqrt(fan_in))."""
    kw, kb = jax.random.split(key)
    bound = 1.0 / jnp.sqrt(fan_in)
    w = jax.random.uniform(kw, (fan_in, fan_out), jnp.float32, -bound, bound)
    b = jax.random.uniform(kb, (1, fan_out), jnp.float32, -bound, bound)
    return w, b


def init_params(key, kinds):
    _, _, _, features_total = _feature_layout(kinds)
    keys = jax.random.split(key, 6)
    p = {}
    p["w_text"], p["b_text"] = _linear_init(keys[0], EMBED_DIM, REDUCED_DIM)
    p["w_img"], p["b_img"] = _linear_init(keys[1], EMBED_DIM, REDUCED_DIM)
    p["w1"], p["b1"] = _linear_init(keys[2], features_total, HIDDEN_DIM1)
    p["w2"], p["b2"] = _linear_init(keys[3], HIDDEN_DIM1, HIDDEN_DIM2)
    p["w3"], p["b3"] = _linear_init(keys[4], HIDDEN_DIM2, HIDDEN_DIM2)
    p["wl"], p["bl"] = _linear_init(keys[5], HIDDEN_DIM2, NUM_CLASSES)
    # nn.PReLU() default: one shared parameter, init 0.25
    p["a1"] = jnp.full((1,), 0.25, jnp.float32)
    p["a2"] = jnp.full((1,), 0.25, jnp.float32)
    p["a3"] = jnp.full((1,), 0.25, jnp.float32)
    return p


def prepare_params(params, kinds):
    """One-time, host-side re-layout of the weights for the fused kernel."""
    numeric_rows, embed_rows, _, _ = _feature_layout(kinds)
    w1 = params["w1"]
    w1n = w1[jnp.asarray(numeric_rows, jnp.int32), :]             # (n_num, H1)
    w1e = jnp.stack([w1[jnp.asarray(r, jnp.int32), :] for r in embed_rows],
                    axis=0)                                       # (n_emb, 30, H1)
    wl_pad = jnp.zeros((HIDDEN_DIM2, OUT_PAD), jnp.float32)
    wl_pad = wl_pad.at[:, :NUM_CLASSES].set(params["wl"])
    bl_pad = jnp.full((1, OUT_PAD), NEG_FILL, jnp.float32)
    bl_pad = bl_pad.at[:, :NUM_CLASSES].set(params["bl"])
    alphas = jnp.concatenate([params["a1"], params["a2"], params["a3"]])
    return {
        "alphas": alphas.astype(jnp.float32),
        "wt": params["w_text"], "bt": params["b_text"],
        "wi": params["w_img"], "bi": params["b_img"],
        "w1n": w1n, "w1e": w1e, "b1": params["b1"],
        "w2": params["w2"], "b2": params["b2"],
        "w3": params["w3"], "b3": params["b3"],
        "wl_pad": wl_pad, "bl_pad": bl_pad,
    }


# --------------------------- pure-JAX reference -----------------------------
def reference_forward(kinds, numeric, emb_stack, params):
    """Batched reference: numeric (B, n_num), emb_stack (n_emb, B, 768)."""
    pieces, ni, ei = [], 0, 0
    for k in kinds:
        if k == "numeric":
            pieces.append(numeric[:, ni:ni + 1]); ni += 1
        else:
            w = params["w_img"] if k == "image" else params["w_text"]
            b = params["b_img"] if k == "image" else params["b_text"]
            pieces.append(jnp.maximum(emb_stack[ei] @ w + b, 0.0)); ei += 1
    x = jnp.concatenate(pieces, axis=1)

    def prelu(v, a):
        return jnp.maximum(v, 0.0) + a * jnp.minimum(v, 0.0)

    h1 = prelu(x @ params["w1"] + params["b1"], params["a1"][0])
    h2 = prelu(h1 @ params["w2"] + params["b2"], params["a2"][0])
    h3 = prelu(h2 @ params["w3"] + params["b3"], params["a3"][0])
    logits = h3 @ params["wl"] + params["bl"]
    return jax.nn.softmax(logits, axis=-1)


# --------------------------------- main -------------------------------------
if __name__ == "__main__":
    # synthetic sample layout: 4 numeric + 2 text + 1 image feature
    kinds = ("numeric", "text", "numeric", "numeric", "image", "text", "numeric")
    BATCH = 32
    TILE = 16            # sublane-aligned batch tile -> grid = (2,)

    key = jax.random.PRNGKey(0)
    k_params, k_num, k_emb = jax.random.split(key, 3)

    params = init_params(k_params, kinds)
    kparams = prepare_params(params, kinds)

    n_num = sum(k == "numeric" for k in kinds)
    n_emb = sum(k != "numeric" for k in kinds)
    # device arrays (no host round-trips): numeric feature values and the
    # precomputed 768-d BERT/ResNet-style embeddings, stacked (n_emb, B, 768)
    numeric = jax.random.normal(k_num, (BATCH, n_num), jnp.float32)
    emb_stack = jax.random.normal(k_emb, (n_emb, BATCH, EMBED_DIM), jnp.float32)

    forward = jax.jit(build_forward(kinds, batch_tile=TILE))
    probs = jax.block_until_ready(forward(numeric, emb_stack, kparams))

    ref = reference_forward(kinds, numeric, emb_stack, params)
    assert probs.shape == (BATCH, NUM_CLASSES)
    assert bool(jnp.allclose(jnp.sum(probs, axis=-1), 1.0, atol=1e-4))
    assert bool(jnp.allclose(probs, ref, atol=2e-3))
    print("KERNEL_OK")
</pallas_src>

<mosaic_0001>
module attributes {stable_mosaic.version = 11 : i64} {
  func.func @kernel(%arg0: i32, %arg1: memref<3xf32, #tpu.memory_space<smem>>, %arg2: memref<16x4xf32, #tpu.memory_space<vmem>>, %arg3: memref<3x16x768xf32, #tpu.memory_space<vmem>>, %arg4: memref<768x30xf32, #tpu.memory_space<vmem>>, %arg5: memref<1x30xf32, #tpu.memory_space<vmem>>, %arg6: memref<768x30xf32, #tpu.memory_space<vmem>>, %arg7: memref<1x30xf32, #tpu.memory_space<vmem>>, %arg8: memref<4x64xf32, #tpu.memory_space<vmem>>, %arg9: memref<3x30x64xf32, #tpu.memory_space<vmem>>, %arg10: memref<1x64xf32, #tpu.memory_space<vmem>>, %arg11: memref<64x32xf32, #tpu.memory_space<vmem>>, %arg12: memref<1x32xf32, #tpu.memory_space<vmem>>, %arg13: memref<32x32xf32, #tpu.memory_space<vmem>>, %arg14: memref<1x32xf32, #tpu.memory_space<vmem>>, %arg15: memref<32x128xf32, #tpu.memory_space<vmem>>, %arg16: memref<1x128xf32, #tpu.memory_space<vmem>>, %arg17: memref<16x128xf32, #tpu.memory_space<vmem>>) attributes {dimension_semantics = [#tpu.dimension_semantics<parallel>], iteration_bounds = array<i64: 2>, scalar_prefetch = 0 : i64, scratch_operands = 0 : i64, tpu.core_type = #tpu.core_type<tc>, window_params = [{transform_indices = @transform_0, window_bounds = array<i64: 3>}, {transform_indices = @transform_1, window_bounds = array<i64: 16, 4>}, {transform_indices = @transform_2, window_bounds = array<i64: 3, 16, 768>}, {pipeline_mode = #tpu.pipeline_mode<synchronous>, transform_indices = @transform_3, window_bounds = array<i64: 768, 30>}, {pipeline_mode = #tpu.pipeline_mode<synchronous>, transform_indices = @transform_4, window_bounds = array<i64: 1, 30>}, {pipeline_mode = #tpu.pipeline_mode<synchronous>, transform_indices = @transform_5, window_bounds = array<i64: 768, 30>}, {pipeline_mode = #tpu.pipeline_mode<synchronous>, transform_indices = @transform_6, window_bounds = array<i64: 1, 30>}, {pipeline_mode = #tpu.pipeline_mode<synchronous>, transform_indices = @transform_7, window_bounds = array<i64: 4, 64>}, {pipeline_mode = #tpu.pipeline_mode<synchronous>, transform_indices = @transform_8, window_bounds = array<i64: 3, 30, 64>}, {pipeline_mode = #tpu.pipeline_mode<synchronous>, transform_indices = @transform_9, window_bounds = array<i64: 1, 64>}, {pipeline_mode = #tpu.pipeline_mode<synchronous>, transform_indices = @transform_10, window_bounds = array<i64: 64, 32>}, {pipeline_mode = #tpu.pipeline_mode<synchronous>, transform_indices = @transform_11, window_bounds = array<i64: 1, 32>}, {pipeline_mode = #tpu.pipeline_mode<synchronous>, transform_indices = @transform_12, window_bounds = array<i64: 32, 32>}, {pipeline_mode = #tpu.pipeline_mode<synchronous>, transform_indices = @transform_13, window_bounds = array<i64: 1, 32>}, {pipeline_mode = #tpu.pipeline_mode<synchronous>, transform_indices = @transform_14, window_bounds = array<i64: 32, 128>}, {pipeline_mode = #tpu.pipeline_mode<synchronous>, transform_indices = @transform_15, window_bounds = array<i64: 1, 128>}, {transform_indices = @transform_16, window_bounds = array<i64: 16, 128>}]} {
    %c0 = arith.constant 0 : index
    %c0_0 = arith.constant 0 : index
    %0 = vector.load %arg2[%c0, %c0_0] : memref<16x4xf32, #tpu.memory_space<vmem>>, vector<16x4xf32>
    %c0_1 = arith.constant 0 : index
    %c0_2 = arith.constant 0 : index
    %1 = vector.load %arg8[%c0_1, %c0_2] : memref<4x64xf32, #tpu.memory_space<vmem>>, vector<4x64xf32>
    %cst = arith.constant dense<0.000000e+00> : vector<16x64xf32>
    %2 = tpu.matmul %0, %1, %cst {dimension_numbers = #tpu.dot_dimension_numbers<[1], [0], [0], [1], [0, 0, 1, 1], [], []>} : vector<16x4xf32>, vector<4x64xf32>, vector<16x64xf32> -> vector<16x64xf32>
    %c0_3 = arith.constant 0 : index
    %c0_4 = arith.constant 0 : index
    %3 = vector.load %arg10[%c0_3, %c0_4] : memref<1x64xf32, #tpu.memory_space<vmem>>, vector<1x64xf32>
    %4 = vector.broadcast %3 : vector<1x64xf32> to vector<16x64xf32>
    %5 = arith.addf %2, %4 : vector<16x64xf32>
    %c0_5 = arith.constant 0 : index
    %c0_6 = arith.constant 0 : index
    %c0_7 = arith.constant 0 : index
    %6 = vector.load %arg3[%c0_5, %c0_6, %c0_7] : memref<3x16x768xf32, #tpu.memory_space<vmem>>, vector<1x16x768xf32>
    %7 = vector.shape_cast %6 : vector<1x16x768xf32> to vector<16x768xf32>
    %c0_8 = arith.constant 0 : index
    %c0_9 = arith.constant 0 : index
    %8 = vector.load %arg4[%c0_8, %c0_9] : memref<768x30xf32, #tpu.memory_space<vmem>>, vector<768x30xf32>
    %cst_10 = arith.constant dense<0.000000e+00> : vector<16x30xf32>
    %9 = tpu.matmul %7, %8, %cst_10 {dimension_numbers = #tpu.dot_dimension_numbers<[1], [0], [0], [1], [0, 0, 1, 1], [], []>} : vector<16x768xf32>, vector<768x30xf32>, vector<16x30xf32> -> vector<16x30xf32>
    %c0_11 = arith.constant 0 : index
    %c0_12 = arith.constant 0 : index
    %10 = vector.load %arg5[%c0_11, %c0_12] : memref<1x30xf32, #tpu.memory_space<vmem>>, vector<1x30xf32>
    %11 = vector.broadcast %10 : vector<1x30xf32> to vector<16x30xf32>
    %12 = arith.addf %9, %11 : vector<16x30xf32>
    %cst_13 = arith.constant 0.000000e+00 : f32
    %13 = vector.broadcast %cst_13 : f32 to vector<16x30xf32>
    %14 = arith.maximumf %12, %13 : vector<16x30xf32>
    %c0_14 = arith.constant 0 : index
    %c0_15 = arith.constant 0 : index
    %c0_16 = arith.constant 0 : index
    %15 = vector.load %arg9[%c0_14, %c0_15, %c0_16] : memref<3x30x64xf32, #tpu.memory_space<vmem>>, vector<1x30x64xf32>
    %16 = vector.shape_cast %15 : vector<1x30x64xf32> to vector<30x64xf32>
    %cst_17 = arith.constant dense<0.000000e+00> : vector<16x64xf32>
    %17 = tpu.matmul %14, %16, %cst_17 {dimension_numbers = #tpu.dot_dimension_numbers<[1], [0], [0], [1], [0, 0, 1, 1], [], []>} : vector<16x30xf32>, vector<30x64xf32>, vector<16x64xf32> -> vector<16x64xf32>
    %18 = arith.addf %5, %17 : vector<16x64xf32>
    %c1 = arith.constant 1 : index
    %c0_18 = arith.constant 0 : index
    %c0_19 = arith.constant 0 : index
    %19 = vector.load %arg3[%c1, %c0_18, %c0_19] : memref<3x16x768xf32, #tpu.memory_space<vmem>>, vector<1x16x768xf32>
    %20 = vector.shape_cast %19 : vector<1x16x768xf32> to vector<16x768xf32>
    %c0_20 = arith.constant 0 : index
    %c0_21 = arith.constant 0 : index
    %21 = vector.load %arg6[%c0_20, %c0_21] : memref<768x30xf32, #tpu.memory_space<vmem>>, vector<768x30xf32>
    %cst_22 = arith.constant dense<0.000000e+00> : vector<16x30xf32>
    %22 = tpu.matmul %20, %21, %cst_22 {dimension_numbers = #tpu.dot_dimension_numbers<[1], [0], [0], [1], [0, 0, 1, 1], [], []>} : vector<16x768xf32>, vector<768x30xf32>, vector<16x30xf32> -> vector<16x30xf32>
    %c0_23 = arith.constant 0 : index
    %c0_24 = arith.constant 0 : index
    %23 = vector.load %arg7[%c0_23, %c0_24] : memref<1x30xf32, #tpu.memory_space<vmem>>, vector<1x30xf32>
    %24 = vector.broadcast %23 : vector<1x30xf32> to vector<16x30xf32>
    %25 = arith.addf %22, %24 : vector<16x30xf32>
    %cst_25 = arith.constant 0.000000e+00 : f32
    %26 = vector.broadcast %cst_25 : f32 to vector<16x30xf32>
    %27 = arith.maximumf %25, %26 : vector<16x30xf32>
    %c1_26 = arith.constant 1 : index
    %c0_27 = arith.constant 0 : index
    %c0_28 = arith.constant 0 : index
    %28 = vector.load %arg9[%c1_26, %c0_27, %c0_28] : memref<3x30x64xf32, #tpu.memory_space<vmem>>, vector<1x30x64xf32>
    %29 = vector.shape_cast %28 : vector<1x30x64xf32> to vector<30x64xf32>
    %cst_29 = arith.constant dense<0.000000e+00> : vector<16x64xf32>
    %30 = tpu.matmul %27, %29, %cst_29 {dimension_numbers = #tpu.dot_dimension_numbers<[1], [0], [0], [1], [0, 0, 1, 1], [], []>} : vector<16x30xf32>, vector<30x64xf32>, vector<16x64xf32> -> vector<16x64xf32>
    %31 = arith.addf %18, %30 : vector<16x64xf32>
    %c2 = arith.constant 2 : index
    %c0_30 = arith.constant 0 : index
    %c0_31 = arith.constant 0 : index
    %32 = vector.load %arg3[%c2, %c0_30, %c0_31] : memref<3x16x768xf32, #tpu.memory_space<vmem>>, vector<1x16x768xf32>
    %33 = vector.shape_cast %32 : vector<1x16x768xf32> to vector<16x768xf32>
    %c0_32 = arith.constant 0 : index
    %c0_33 = arith.constant 0 : index
    %34 = vector.load %arg4[%c0_32, %c0_33] : memref<768x30xf32, #tpu.memory_space<vmem>>, vector<768x30xf32>
    %cst_34 = arith.constant dense<0.000000e+00> : vector<16x30xf32>
    %35 = tpu.matmul %33, %34, %cst_34 {dimension_numbers = #tpu.dot_dimension_numbers<[1], [0], [0], [1], [0, 0, 1, 1], [], []>} : vector<16x768xf32>, vector<768x30xf32>, vector<16x30xf32> -> vector<16x30xf32>
    %c0_35 = arith.constant 0 : index
    %c0_36 = arith.constant 0 : index
    %36 = vector.load %arg5[%c0_35, %c0_36] : memref<1x30xf32, #tpu.memory_space<vmem>>, vector<1x30xf32>
    %37 = vector.broadcast %36 : vector<1x30xf32> to vector<16x30xf32>
    %38 = arith.addf %35, %37 : vector<16x30xf32>
    %cst_37 = arith.constant 0.000000e+00 : f32
    %39 = vector.broadcast %cst_37 : f32 to vector<16x30xf32>
    %40 = arith.maximumf %38, %39 : vector<16x30xf32>
    %c2_38 = arith.constant 2 : index
    %c0_39 = arith.constant 0 : index
    %c0_40 = arith.constant 0 : index
    %41 = vector.load %arg9[%c2_38, %c0_39, %c0_40] : memref<3x30x64xf32, #tpu.memory_space<vmem>>, vector<1x30x64xf32>
    %42 = vector.shape_cast %41 : vector<1x30x64xf32> to vector<30x64xf32>
    %cst_41 = arith.constant dense<0.000000e+00> : vector<16x64xf32>
    %43 = tpu.matmul %40, %42, %cst_41 {dimension_numbers = #tpu.dot_dimension_numbers<[1], [0], [0], [1], [0, 0, 1, 1], [], []>} : vector<16x30xf32>, vector<30x64xf32>, vector<16x64xf32> -> vector<16x64xf32>
    %44 = arith.addf %31, %43 : vector<16x64xf32>
    %c0_42 = arith.constant 0 : index
    %45 = memref.load %arg1[%c0_42] : memref<3xf32, #tpu.memory_space<smem>>
    %cst_43 = arith.constant 0.000000e+00 : f32
    %46 = vector.broadcast %cst_43 : f32 to vector<16x64xf32>
    %47 = arith.maximumf %44, %46 : vector<16x64xf32>
    %cst_44 = arith.constant 0.000000e+00 : f32
    %48 = vector.broadcast %cst_44 : f32 to vector<16x64xf32>
    %49 = arith.minimumf %44, %48 : vector<16x64xf32>
    %50 = vector.broadcast %45 : f32 to vector<16x64xf32>
    %51 = arith.mulf %50, %49 : vector<16x64xf32>
    %52 = arith.addf %47, %51 : vector<16x64xf32>
    %c0_45 = arith.constant 0 : index
    %c0_46 = arith.constant 0 : index
    %53 = vector.load %arg11[%c0_45, %c0_46] : memref<64x32xf32, #tpu.memory_space<vmem>>, vector<64x32xf32>
    %cst_47 = arith.constant dense<0.000000e+00> : vector<16x32xf32>
    %54 = tpu.matmul %52, %53, %cst_47 {dimension_numbers = #tpu.dot_dimension_numbers<[1], [0], [0], [1], [0, 0, 1, 1], [], []>} : vector<16x64xf32>, vector<64x32xf32>, vector<16x32xf32> -> vector<16x32xf32>
    %c0_48 = arith.constant 0 : index
    %c0_49 = arith.constant 0 : index
    %55 = vector.load %arg12[%c0_48, %c0_49] : memref<1x32xf32, #tpu.memory_space<vmem>>, vector<1x32xf32>
    %56 = vector.broadcast %55 : vector<1x32xf32> to vector<16x32xf32>
    %57 = arith.addf %54, %56 : vector<16x32xf32>
    %c1_50 = arith.constant 1 : index
    %58 = memref.load %arg1[%c1_50] : memref<3xf32, #tpu.memory_space<smem>>
    %cst_51 = arith.constant 0.000000e+00 : f32
    %59 = vector.broadcast %cst_51 : f32 to vector<16x32xf32>
    %60 = arith.maximumf %57, %59 : vector<16x32xf32>
    %cst_52 = arith.constant 0.000000e+00 : f32
    %61 = vector.broadcast %cst_52 : f32 to vector<16x32xf32>
    %62 = arith.minimumf %57, %61 : vector<16x32xf32>
    %63 = vector.broadcast %58 : f32 to vector<16x32xf32>
    %64 = arith.mulf %63, %62 : vector<16x32xf32>
    %65 = arith.addf %60, %64 : vector<16x32xf32>
    %c0_53 = arith.constant 0 : index
    %c0_54 = arith.constant 0 : index
    %66 = vector.load %arg13[%c0_53, %c0_54] : memref<32x32xf32, #tpu.memory_space<vmem>>, vector<32x32xf32>
    %cst_55 = arith.constant dense<0.000000e+00> : vector<16x32xf32>
    %67 = tpu.matmul %65, %66, %cst_55 {dimension_numbers = #tpu.dot_dimension_numbers<[1], [0], [0], [1], [0, 0, 1, 1], [], []>} : vector<16x32xf32>, vector<32x32xf32>, vector<16x32xf32> -> vector<16x32xf32>
    %c0_56 = arith.constant 0 : index
    %c0_57 = arith.constant 0 : index
    %68 = vector.load %arg14[%c0_56, %c0_57] : memref<1x32xf32, #tpu.memory_space<vmem>>, vector<1x32xf32>
    %69 = vector.broadcast %68 : vector<1x32xf32> to vector<16x32xf32>
    %70 = arith.addf %67, %69 : vector<16x32xf32>
    %c2_58 = arith.constant 2 : index
    %71 = memref.load %arg1[%c2_58] : memref<3xf32, #tpu.memory_space<smem>>
    %cst_59 = arith.constant 0.000000e+00 : f32
    %72 = vector.broadcast %cst_59 : f32 to vector<16x32xf32>
    %73 = arith.maximumf %70, %72 : vector<16x32xf32>
    %cst_60 = arith.constant 0.000000e+00 : f32
    %74 = vector.broadcast %cst_60 : f32 to vector<16x32xf32>
    %75 = arith.minimumf %70, %74 : vector<16x32xf32>
    %76 = vector.broadcast %71 : f32 to vector<16x32xf32>
    %77 = arith.mulf %76, %75 : vector<16x32xf32>
    %78 = arith.addf %73, %77 : vector<16x32xf32>
    %c0_61 = arith.constant 0 : index
    %c0_62 = arith.constant 0 : index
    %79 = vector.load %arg15[%c0_61, %c0_62] : memref<32x128xf32, #tpu.memory_space<vmem>>, vector<32x128xf32>
    %cst_63 = arith.constant dense<0.000000e+00> : vector<16x128xf32>
    %80 = tpu.matmul %78, %79, %cst_63 {dimension_numbers = #tpu.dot_dimension_numbers<[1], [0], [0], [1], [0, 0, 1, 1], [], []>} : vector<16x32xf32>, vector<32x128xf32>, vector<16x128xf32> -> vector<16x128xf32>
    %c0_64 = arith.constant 0 : index
    %c0_65 = arith.constant 0 : index
    %81 = vector.load %arg16[%c0_64, %c0_65] : memref<1x128xf32, #tpu.memory_space<vmem>>, vector<1x128xf32>
    %82 = vector.broadcast %81 : vector<1x128xf32> to vector<16x128xf32>
    %83 = arith.addf %80, %82 : vector<16x128xf32>
    %cst_66 = arith.constant dense<0xFF800000> : vector<16xf32>
    %84 = vector.multi_reduction <maximumf>, %83, %cst_66 [1] : vector<16x128xf32> to vector<16xf32>
    %85 = vector.shape_cast %84 : vector<16xf32> to vector<16x1xf32>
    %86 = vector.broadcast %85 : vector<16x1xf32> to vector<16x128xf32>
    %87 = arith.subf %83, %86 : vector<16x128xf32>
    %88 = math.exp %87 : vector<16x128xf32>
    %cst_67 = arith.constant dense<0.000000e+00> : vector<16xf32>
    %89 = vector.multi_reduction <add>, %88, %cst_67 [1] : vector<16x128xf32> to vector<16xf32>
    %90 = vector.shape_cast %89 : vector<16xf32> to vector<16x1xf32>
    %91 = vector.broadcast %90 : vector<16x1xf32> to vector<16x128xf32>
    %92 = arith.divf %88, %91 : vector<16x128xf32>
    %c0_68 = arith.constant 0 : index
    %c0_69 = arith.constant 0 : index
    %93 = vector.load %arg17[%c0_68, %c0_69] : memref<16x128xf32, #tpu.memory_space<vmem>>, vector<16x128xf32>
    tpu.vector_store %arg17[%c0_68, %c0_69], %92 {strides = array<i32>} : memref<16x128xf32, #tpu.memory_space<vmem>>, vector<16x128xf32>,
    return
  }
  func.func @transform_0(%arg0: i32) -> i32 {
    %c0_i32 = arith.constant 0 : i32
    %c0_i32_0 = arith.constant 0 : i32
    return %c0_i32 : i32
  }
  func.func @transform_1(%arg0: i32) -> (i32, i32) {
    %c0_i32 = arith.constant 0 : i32
    %c0_i32_0 = arith.constant 0 : i32
    return %arg0, %c0_i32 : i32, i32
  }
  func.func @transform_2(%arg0: i32) -> (i32, i32, i32) {
    %c0_i32 = arith.constant 0 : i32
    %c0_i32_0 = arith.constant 0 : i32
    %c0_i32_1 = arith.constant 0 : i32
    return %c0_i32, %arg0, %c0_i32_0 : i32, i32, i32
  }
  func.func @transform_3(%arg0: i32) -> (i32, i32) {
    %c0_i32 = arith.constant 0 : i32
    %c0_i32_0 = arith.constant 0 : i32
    %c0_i32_1 = arith.constant 0 : i32
    return %c0_i32, %c0_i32_0 : i32, i32
  }
  func.func @transform_4(%arg0: i32) -> (i32, i32) {
    %c0_i32 = arith.constant 0 : i32
    %c0_i32_0 = arith.constant 0 : i32
    %c0_i32_1 = arith.constant 0 : i32
    return %c0_i32, %c0_i32_0 : i32, i32
  }
  func.func @transform_5(%arg0: i32) -> (i32, i32) {
    %c0_i32 = arith.constant 0 : i32
    %c0_i32_0 = arith.constant 0 : i32
    %c0_i32_1 = arith.constant 0 : i32
    return %c0_i32, %c0_i32_0 : i32, i32
  }
  func.func @transform_6(%arg0: i32) -> (i32, i32) {
    %c0_i32 = arith.constant 0 : i32
    %c0_i32_0 = arith.constant 0 : i32
    %c0_i32_1 = arith.constant 0 : i32
    return %c0_i32, %c0_i32_0 : i32, i32
  }
  func.func @transform_7(%arg0: i32) -> (i32, i32) {
    %c0_i32 = arith.constant 0 : i32
    %c0_i32_0 = arith.constant 0 : i32
    %c0_i32_1 = arith.constant 0 : i32
    return %c0_i32, %c0_i32_0 : i32, i32
  }
  func.func @transform_8(%arg0: i32) -> (i32, i32, i32) {
    %c0_i32 = arith.constant 0 : i32
    %c0_i32_0 = arith.constant 0 : i32
    %c0_i32_1 = arith.constant 0 : i32
    %c0_i32_2 = arith.constant 0 : i32
    return %c0_i32, %c0_i32_0, %c0_i32_1 : i32, i32, i32
  }
  func.func @transform_9(%arg0: i32) -> (i32, i32) {
    %c0_i32 = arith.constant 0 : i32
    %c0_i32_0 = arith.constant 0 : i32
    %c0_i32_1 = arith.constant 0 : i32
    return %c0_i32, %c0_i32_0 : i32, i32
  }
  func.func @transform_10(%arg0: i32) -> (i32, i32) {
    %c0_i32 = arith.constant 0 : i32
    %c0_i32_0 = arith.constant 0 : i32
    %c0_i32_1 = arith.constant 0 : i32
    return %c0_i32, %c0_i32_0 : i32, i32
  }
  func.func @transform_11(%arg0: i32) -> (i32, i32) {
    %c0_i32 = arith.constant 0 : i32
    %c0_i32_0 = arith.constant 0 : i32
    %c0_i32_1 = arith.constant 0 : i32
    return %c0_i32, %c0_i32_0 : i32, i32
  }
  func.func @transform_12(%arg0: i32) -> (i32, i32) {
    %c0_i32 = arith.constant 0 : i32
    %c0_i32_0 = arith.constant 0 : i32
    %c0_i32_1 = arith.constant 0 : i32
    return %c0_i32, %c0_i32_0 : i32, i32
  }
  func.func @transform_13(%arg0: i32) -> (i32, i32) {
    %c0_i32 = arith.constant 0 : i32
    %c0_i32_0 = arith.constant 0 : i32
    %c0_i32_1 = arith.constant 0 : i32
    return %c0_i32, %c0_i32_0 : i32, i32
  }
  func.func @transform_14(%arg0: i32) -> (i32, i32) {
    %c0_i32 = arith.constant 0 : i32
    %c0_i32_0 = arith.constant 0 : i32
    %c0_i32_1 = arith.constant 0 : i32
    return %c0_i32, %c0_i32_0 : i32, i32
  }
  func.func @transform_15(%arg0: i32) -> (i32, i32) {
    %c0_i32 = arith.constant 0 : i32
    %c0_i32_0 = arith.constant 0 : i32
    %c0_i32_1 = arith.constant 0 : i32
    return %c0_i32, %c0_i32_0 : i32, i32
  }
  func.func @transform_16(%arg0: i32) -> (i32, i32) {
    %c0_i32 = arith.constant 0 : i32
    %c0_i32_0 = arith.constant 0 : i32
    return %arg0, %c0_i32 : i32, i32
  }
}

</mosaic_0001>

<bundles_post_ra>
// kernel: forward.1
= control target key start
LH: loop header
LB: loop body
LE: loop exit
PB: predicated region body
PF: predicated region fallthrough
CT: control target
= control target key end

     0   :  { %s4549_s0 = inlined_call_operand.vmem [shape: f32[3], index: 0, kind: input, shape index: {}]   ;;  %s4550_s1 = inlined_call_operand.vmem [shape: f32[32,4], index: 1, kind: input, shape index: {}]   ;;  %s4551_s2 = inlined_call_operand.vmem [shape: f32[3,32,768], index: 2, kind: input, shape index: {}]   ;;  %s4552_s3 = inlined_call_operand.vmem [shape: f32[768,30], index: 3, kind: input, shape index: {}]   ;;  %s4553_s4 = inlined_call_operand.vmem [shape: f32[1,30], index: 4, kind: input, shape index: {}]   ;;  %s4554_s5 = inlined_call_operand.vmem [shape: f32[768,30], index: 5, kind: input, shape index: {}]   ;;  %s4555_s6 = inlined_call_operand.vmem [shape: f32[1,30], index: 6, kind: input, shape index: {}]   ;;  %s4556_s7 = inlined_call_operand.vmem [shape: f32[4,64], index: 7, kind: input, shape index: {}]   ;;  %s4557_s8 = inlined_call_operand.vmem [shape: f32[3,30,64], index: 8, kind: input, shape index: {}]   ;;  %s4558_s9 = inlined_call_operand.vmem [shape: f32[1,64], index: 9, kind: input, shape index: {}]   ;;  %s4559_s10 = inlined_call_operand.vmem [shape: f32[64,32], index: 10, kind: input, shape index: {}]   ;;  %s4560_s11 = inlined_call_operand.vmem [shape: f32[1,32], index: 11, kind: input, shape index: {}]   ;;  %s4561_s12 = inlined_call_operand.vmem [shape: f32[32,32], index: 12, kind: input, shape index: {}]   ;;  %s4562_s13 = inlined_call_operand.vmem [shape: f32[1,32], index: 13, kind: input, shape index: {}]   ;;  %s4563_s14 = inlined_call_operand.vmem [shape: f32[32,128], index: 14, kind: input, shape index: {}]   ;;  %s4564_s15 = inlined_call_operand.vmem [shape: f32[1,128], index: 15, kind: input, shape index: {}]   ;;  %s4565_s16 = inlined_call_operand.vmem [shape: f32[32,128], index: 16, kind: output, shape index: {}]  }
   0x1   :  { %4567 = sst [smem:[#allocation7_spill]] %s4549_s0 }
   0x2   :  { %21 = vsyncpa [#allocation3], 0  ;;  %s3437_s21 = smov 0   ;;  %s3439_s22 = smov 0  }
   0x3   :  { %s3441_s23 = smov 0  }
   0x4 LB: > { %s4566_s24 = sadd.s32 4294967295, %s3348_s23   ;;  %s3454_s25 = sadd.s32 1, %s3348_s23   ;;  %s3348_s23 = sphi %s3441_s23, %s4579_s23   ;;  %s3344_s22 = sphi %s3439_s22, %s4578_s22   ;;  %s3340_s21 = sphi %s3437_s21, %s4577_s21  }
   0x5   : > { %s78_s26 = ssub.s32 %s3348_s23, %s3454_s25  ;;  %s81_s27 = sadd.s32 1, %s3344_s22 }
   0x6   : > { %p79_p0 = scmp.eq.s32.totalorder %s78_s26, 0  ;;  %p88_p1 = scmp.ne.s32.totalorder %s3344_s22, %s3340_s21 }
   0x7   : > { %p89_p2 = scmp.eq.s32.totalorder %s3348_s23, 0  ;;  %p2366_p3 = scmp.ge.s32.totalorder %s3348_s23, 1 }
   0x8   : > { %s3464_s28 = scalar_select %p79_p0, %s3344_s22, %s81_s27  }
   0x9   : > { %p3466_p4 = por %p89_p2, %p88_p1  ;;  %p404_p5 = scmp.lt.s32.totalorder %s3348_s23, 3 }
   0xa   : > { %4568 = sst [smem:[#allocation6_spill]] %s3464_s28  ;;  %p3473_p6 = scmp.eq.s32.totalorder %s4566_s24, 0 }
   0xb   : > { %p3477_p7 = pnand %p2366_p3, %p404_p5  ;;  %s4572_s19 = sld [smem:[#allocation7_spill]] }
   0xd   : > { %p3267_p8 = pneg %p3477_p7 }
   0xf   : > { %p3268_p9 = pnand %p3473_p6, %p3267_p8 }
  0x11   : > { %s417_s20 = sshll.u32 %s4572_s19, 4  ;;  %p3309_p11 = pneg %p3268_p9  ;;  %s418_s20 = int_to_ptr.vmem [resolvable:$true] %s417_s20 }
  0x12   : > { %s3307_s26 = scalar_lea.vmem %s418_s20, 16  ;;  %p3315_p0 = scmp.lt.s32.totalorder %s418_s20, %s418_s20 }
  0x13   : > { %p3308_p10 = scmp.ne.s32.totalorder %s418_s20, %s3307_s26  ;;  %p3316_p1 = scmp.lt.s32.totalorder %s3307_s26, %s3307_s26 }
  0x15   : > { %p3310_p12 = pnand %p3309_p11, %p3308_p10  ;;  %p3317_p2 = por %p3316_p1, %p3315_p0 }
  0x17   : > { %p3311_p13 = pneg %p3310_p12 }
  0x19   : > { %p3318_p3 = pnand %p3317_p2, %p3311_p13 }
  0x1b   : > { %3321 = shalt.err (!%p3318_p3)
}
  0x1c   : > { %s3350_s27 = smov [#allocation2]   ;;  %p2368_p5 = scmp.ge.s32.totalorder %s3348_s23, 2 }
  0x1d   : > { %3270 = dma.vmem_to_smem (!%p3268_p9), %s418_s20, 16, %s3350_s27, [#allocation3]  }
  0x1e   : > { %463 = sbr.rel (%p2368_p5) target bundleno = 60 (0x3c), region = 72 }
  0x25   : > { %475 = sbr.rel (!%p3466_p4) target bundleno = 60 (0x3c), region = 80  ;;  %s477_s17 = sand.u32 (%p3466_p4), 1, %s3344_s22  }
  0x26   : > { %s3261_s18 = smul.u32 (%p3466_p4), 96, %s3348_s23 }
  0x27   : > { %s3260_s19 = smul.u32 (%p3466_p4), 288, %s477_s17 }
  0x28   : > { %s3496_s26 = scalar_lea.vmem (%p3466_p4), %s4551_s2, %s3261_s18 }
  0x29   : > { %v496_v0 = vld [vmem:[%s3496_s26] sm:$0xff] (%p3466_p4)  ;;  %v498_v1 = vld [vmem:[%s3496_s26 + $0x8] sm:$0xff] (%p3466_p4)  ;;  %v500_v2 = vld [vmem:[%s3496_s26 + $0x10] sm:$0xff] (%p3466_p4)  ;;  %s3501_s29 = scalar_lea.vmem (%p3466_p4), [#allocation4], %s3260_s19 }
  0x2a   : > { %497 = vst [vmem:[%s3501_s29] sm:$0xff] (%p3466_p4), %v496_v0  ;;  %499 = vst [vmem:[%s3501_s29 + $0x8] sm:$0xff] (%p3466_p4), %v498_v1  ;;  %v502_v3 = vld [vmem:[%s3496_s26 + $0x18] sm:$0xff] (%p3466_p4)  ;;  %v504_v4 = vld [vmem:[%s3496_s26 + $0x20] sm:$0xff] (%p3466_p4) }
  0x2b   : > { %501 = vst [vmem:[%s3501_s29 + $0x10] sm:$0xff] (%p3466_p4), %v500_v2  ;;  %v506_v5 = vld [vmem:[%s3496_s26 + $0x28] sm:$0xff] (%p3466_p4)  ;;  %503 = vst [vmem:[%s3501_s29 + $0x18] sm:$0xff] (%p3466_p4), %v502_v3  ;;  %v508_v6 = vld [vmem:[%s3496_s26 + $0x30] sm:$0xff] (%p3466_p4) }
  0x2c   : > { %505 = vst [vmem:[%s3501_s29 + $0x20] sm:$0xff] %v504_v4  ;;  %507 = vst [vmem:[%s3501_s29 + $0x28] sm:$0xff] %v506_v5  ;;  %v510_v7 = vld [vmem:[%s3496_s26 + $0x38] sm:$0xff]  ;;  %v512_v8 = vld [vmem:[%s3496_s26 + $0x40] sm:$0xff] }
  0x2d   : > { %509 = vst [vmem:[%s3501_s29 + $0x30] sm:$0xff] %v508_v6  ;;  %511 = vst [vmem:[%s3501_s29 + $0x38] sm:$0xff] %v510_v7  ;;  %v514_v9 = vld [vmem:[%s3496_s26 + $0x48] sm:$0xff]  ;;  %v516_v10 = vld [vmem:[%s3496_s26 + $0x50] sm:$0xff] }
  0x2e   : > { %513 = vst [vmem:[%s3501_s29 + $0x40] sm:$0xff] %v512_v8  ;;  %v518_v11 = vld [vmem:[%s3496_s26 + $0x58] sm:$0xff]  ;;  %515 = vst [vmem:[%s3501_s29 + $0x48] sm:$0xff] %v514_v9  ;;  %v520_v12 = vld [vmem:[%s3496_s26 + $0xc0] sm:$0xff] }
  0x2f   : > { %517 = vst [vmem:[%s3501_s29 + $0x50] sm:$0xff] %v516_v10  ;;  %519 = vst [vmem:[%s3501_s29 + $0x58] sm:$0xff] %v518_v11  ;;  %v522_v13 = vld [vmem:[%s3496_s26 + $0xc8] sm:$0xff]  ;;  %v524_v14 = vld [vmem:[%s3496_s26 + $0xd0] sm:$0xff] }
  0x30   : > { %521 = vst [vmem:[%s3501_s29 + $0x60] sm:$0xff] %v520_v12  ;;  %523 = vst [vmem:[%s3501_s29 + $0x68] sm:$0xff] %v522_v13  ;;  %v526_v15 = vld [vmem:[%s3496_s26 + $0xd8] sm:$0xff]  ;;  %v528_v16 = vld [vmem:[%s3496_s26 + $0xe0] sm:$0xff] }
  0x31   : > { %525 = vst [vmem:[%s3501_s29 + $0x70] sm:$0xff] %v524_v14  ;;  %v530_v17 = vld [vmem:[%s3496_s26 + $0xe8] sm:$0xff]  ;;  %527 = vst [vmem:[%s3501_s29 + $0x78] sm:$0xff] %v526_v15  ;;  %v532_v18 = vld [vmem:[%s3496_s26 + $0xf0] sm:$0xff] }
  0x32   : > { %529 = vst [vmem:[%s3501_s29 + $0x80] sm:$0xff] %v528_v16  ;;  %531 = vst [vmem:[%s3501_s29 + $0x88] sm:$0xff] %v530_v17  ;;  %v534_v19 = vld [vmem:[%s3496_s26 + $0xf8] sm:$0xff]  ;;  %v536_v20 = vld [vmem:[%s3496_s26 + $0x100] sm:$0xff] }
  0x33   : > { %533 = vst [vmem:[%s3501_s29 + $0x90] sm:$0xff] %v532_v18  ;;  %535 = vst [vmem:[%s3501_s29 + $0x98] sm:$0xff] %v534_v19  ;;  %v538_v21 = vld [vmem:[%s3496_s26 + $0x108] sm:$0xff]  ;;  %v540_v22 = vld [vmem:[%s3496_s26 + $0x110] sm:$0xff] }
  0x34   : > { %537 = vst [vmem:[%s3501_s29 + $0xa0] sm:$0xff] %v536_v20  ;;  %v542_v23 = vld [vmem:[%s3496_s26 + $0x118] sm:$0xff]  ;;  %539 = vst [vmem:[%s3501_s29 + $0xa8] sm:$0xff] %v538_v21  ;;  %v544_v24 = vld [vmem:[%s3496_s26 + $0x180] sm:$0xff] }
  0x35   : > { %541 = vst [vmem:[%s3501_s29 + $0xb0] sm:$0xff] %v540_v22  ;;  %543 = vst [vmem:[%s3501_s29 + $0xb8] sm:$0xff] %v542_v23  ;;  %v546_v25 = vld [vmem:[%s3496_s26 + $0x188] sm:$0xff]  ;;  %v548_v26 = vld [vmem:[%s3496_s26 + $0x190] sm:$0xff] }
  0x36   : > { %545 = vst [vmem:[%s3501_s29 + $0xc0] sm:$0xff] %v544_v24  ;;  %547 = vst [vmem:[%s3501_s29 + $0xc8] sm:$0xff] %v546_v25  ;;  %v550_v27 = vld [vmem:[%s3496_s26 + $0x198] sm:$0xff]  ;;  %v552_v28 = vld [vmem:[%s3496_s26 + $0x1a0] sm:$0xff] }
  0x37   : > { %549 = vst [vmem:[%s3501_s29 + $0xd0] sm:$0xff] %v548_v26  ;;  %v554_v29 = vld [vmem:[%s3496_s26 + $0x1a8] sm:$0xff]  ;;  %551 = vst [vmem:[%s3501_s29 + $0xd8] sm:$0xff] %v550_v27  ;;  %v556_v30 = vld [vmem:[%s3496_s26 + $0x1b0] sm:$0xff] }
  0x38   : > { %553 = vst [vmem:[%s3501_s29 + $0xe0] sm:$0xff] %v552_v28  ;;  %555 = vst [vmem:[%s3501_s29 + $0xe8] sm:$0xff] %v554_v29  ;;  %v558_v31 = vld [vmem:[%s3496_s26 + $0x1b8] sm:$0xff]  ;;  %v560_v32 = vld [vmem:[%s3496_s26 + $0x1c0] sm:$0xff] }
  0x39   : > { %557 = vst [vmem:[%s3501_s29 + $0xf0] sm:$0xff] %v556_v30  ;;  %559 = vst [vmem:[%s3501_s29 + $0xf8] sm:$0xff] %v558_v31  ;;  %v562_v33 = vld [vmem:[%s3496_s26 + $0x1c8] sm:$0xff]  ;;  %v564_v34 = vld [vmem:[%s3496_s26 + $0x1d0] sm:$0xff] }
  0x3a   : > { %561 = vst [vmem:[%s3501_s29 + $0x100] sm:$0xff] %v560_v32  ;;  %v566_v35 = vld [vmem:[%s3496_s26 + $0x1d8] sm:$0xff]  ;;  %563 = vst [vmem:[%s3501_s29 + $0x108] sm:$0xff] %v562_v33 }
  0x3b   : > { %565 = vst [vmem:[%s3501_s29 + $0x110] sm:$0xff] %v564_v34  ;;  %567 = vst [vmem:[%s3501_s29 + $0x118] sm:$0xff] %v566_v35 }
  0x3c PF: > { %576 = sbr.rel (%p3477_p7) target bundleno = 2105 (0x839), region = 103 }
  0x43   : > { %3335 = dma.done.wait (%p3473_p6), [#allocation3], 16  }
  0x44   : > { %3337 = vsyncadd (%p3473_p6), [#allocation3], 4294967280  ;;  %s583_s24 = sand.u32 1, %s3340_s21  }
  0x45   : > { %s3262_s28 = smul.u32 288, %s583_s24 }
  0x47   : > { %s3579_s20 = scalar_lea.vmem [#allocation4], %s3262_s28 }
  0x48   : > { %589 = sfence }
  0x49   : > { %v775_v36 = vld [vmem:[%s4552_s3 + $0x80] sm:$0xff]  ;;  %v776_v37 = vld [vmem:[%s4552_s3 + $0x88] sm:$0xff]  ;;  %vm668_vm0 = vcmask 1043456   ;;  %s4573_s30 = sadd.s32 4294967295, %s3348_s23   ;;  %v777_v42 = vld [vmem:[%s4552_s3 + $0x90] sm:$0xff]  ;;  %vm661_vm1 = vcmask 31744  }
  0x4a   : > { %v759_v38 = vld [vmem:[%s4552_s3] sm:$0xff]  ;;  %s2374_s21 = sshll.u32 %s4573_s30, 1  ;;  %v3592_v39 = vpack.c.bf16 %v776_v37, %v775_v36  ;;  %v760_v40 = vld [vmem:[%s4552_s3 + $0x8] sm:$0xff]  ;;  %v778_v44 = vld [vmem:[%s4552_s3 + $0x98] sm:$0xff]  ;;  %vm1100_vm2 = vcmask 1045504   ;;  %vm3351_vm3 = vmmov 1  }
  0x4b   : > { %v653_v41 = vld [vmem:[%s4556_s7] sm:$0xf]  ;;  %p639_p4 = scmp.lt.s32.totalorder %s2374_s21, 3  ;;  %v3603_v43 = vpack.c.bf16 %v760_v40, %v759_v38  ;;  %v761_v45 = vld [vmem:[%s4552_s3 + $0x10] sm:$0xff]  ;;  %v762_v46 = vld [vmem:[%s4552_s3 + $0x18] sm:$0xff]  ;;  %v3615_v47 = vpack.c.bf16 %v778_v44, %v777_v42  ;;  %vm1093_vm5 = vcmask 244736  }
  0x4c   : > { %2823 = vmatprep.subr.msk.mxu0 %vm668_vm0, %v653_v41  ;;  %2903 = vmatprep.subr.bf16.mxu1 %v3592_v39  ;;  %v807_v48 = vld [vmem:[%s4552_s3 + $0x180] sm:$0xff]  ;;  %v808_v49 = vld [vmem:[%s4552_s3 + $0x188] sm:$0xff]  ;;  %v3629_v51 = vpack.c.bf16 %v762_v46, %v761_v45  ;;  %v809_v59 = vld [vmem:[%s4552_s3 + $0x190] sm:$0xff]  ;;  %vm1971_vm6 = vcmask 523264   ;;  %vm2074_vm7 = vcmask 261120  }
  0x4d   : > { %2824 = vmatpush3.msk.msra.mxu0 %vm668_vm0, %v653_v41  ;;  %s4581_s21 = smov (!%p639_p4, %s2374_s21), 3  ;;  %v791_v50 = vld [vmem:[%s4552_s3 + $0x100] sm:$0xff]  ;;  %2905 = vmatpush3.bf16.msra.mxu1 %v3603_v43  ;;  %v3631_v52 = vpack.c.bf16 %v808_v49, %v807_v48  ;;  %v792_v53 = vld [vmem:[%s4552_s3 + $0x108] sm:$0xff]  ;;  %v810_v61 = vld [vmem:[%s4552_s3 + $0x198] sm:$0xff] }
  0x4e   : > { %v779_v54 = vld [vmem:[%s4552_s3 + $0xa0] sm:$0xff]  ;;  %v780_v55 = vld [vmem:[%s4552_s3 + $0xa8] sm:$0xff]  ;;  %2907 = vmatprep.subr.bf16.mxu1 %v3615_v47  ;;  %s2375_s28 = sshll.u32 %s4581_s21, 3  ;;  %v3661_v60 = vpack.c.bf16 %v792_v53, %v791_v50  ;;  %v793_v62 = vld [vmem:[%s4552_s3 + $0x110] sm:$0xff]  ;;  %v3672_v2 = vpack.c.bf16 %v810_v61, %v809_v59 }
  0x4f   : > { %v3644_v56 = vpack.c.bf16 %v780_v55, %v779_v54  ;;  %v763_v57 = vld [vmem:[%s4552_s3 + $0x20] sm:$0xff]  ;;  %v764_v58 = vld [vmem:[%s4552_s3 + $0x28] sm:$0xff]  ;;  %s642_s29 = scalar_lea.vmem %s4550_s1, %s2375_s28  ;;  %2935 = vmatprep.subr.bf16.mxu0 %v3631_v52  ;;  %v794_v63 = vld [vmem:[%s4552_s3 + $0x118] sm:$0xff]  ;;  %s649_s30 = scalar_lea.vmem %s4565_s16, %s2375_s28 }
  0x50   : > { %v651_v0 = vld [vmem:[%s642_s29] sm:$0xff]  ;;  %v652_v1 = vld [vmem:[%s642_s29 + $0x8] sm:$0xff]  ;;  %v781_v3 = vld [vmem:[%s4552_s3 + $0xb0] sm:$0xff]  ;;  %v3679_v4 = vpack.c.bf16 %v764_v58, %v763_v57  ;;  %v3701_v11 = vpack.c.bf16 %v794_v63, %v793_v62  ;;  %s1946_s29 = sld [smem:[#allocation2]] }
  0x51   : > { %2825 = vmatprep.mubr.msk.f32.mxu0 %vm661_vm1, %v651_v0  ;;  %2909 = vmatpush3.bf16.msra.mxu1 %v3629_v51  ;;  %v782_v5 = vld [vmem:[%s4552_s3 + $0xb8] sm:$0xff]  ;;  %v765_v6 = vld [vmem:[%s4552_s3 + $0x30] sm:$0xff]  ;;  %v811_v9 = vld [vmem:[%s4552_s3 + $0x1a0] sm:$0xff] }
  0x52   : > { %2826 = vmatmul.mubr.msk.f32.vlgmr.msra.gmra.mrb[0].mxu0 %vm661_vm1, %v652_v1  ;;  %2911 = vmatprep.subr.bf16.mxu1 %v3644_v56  ;;  %v3689_v7 = vpack.c.bf16 %v782_v5, %v781_v3  ;;  %v766_v8 = vld [vmem:[%s4552_s3 + $0x38] sm:$0xff]  ;;  %v812_v10 = vld [vmem:[%s4552_s3 + $0x1a8] sm:$0xff]  ;;  %v783_v12 = vld [vmem:[%s4552_s3 + $0xc0] sm:$0xff] }
  0x53   : > { %2937 = vmatpush3.bf16.msra.mxu0 %v3661_v60  ;;  %v784_v13 = vld [vmem:[%s4552_s3 + $0xc8] sm:$0xff]  ;;  %v3710_v14 = vpack.c.bf16 %v812_v10, %v811_v9  ;;  %v795_v15 = vld [vmem:[%s4552_s3 + $0x120] sm:$0xff]  ;;  %v3719_v17 = vpack.c.bf16 %v766_v8, %v765_v6  ;;  %v813_v18 = vld [vmem:[%s4552_s3 + $0x1b0] sm:$0xff] }
  0x54   : > { %2939 = vmatprep.subr.bf16.mxu0 %v3672_v2  ;;  %v796_v16 = vld [vmem:[%s4552_s3 + $0x128] sm:$0xff]  ;;  %v814_v19 = vld [vmem:[%s4552_s3 + $0x1b8] sm:$0xff]  ;;  %v3728_v20 = vpack.c.bf16 %v784_v13, %v783_v12  ;;  %v767_v21 = vld [vmem:[%s4552_s3 + $0x40] sm:$0xff] }
  0x55   : > { %2913 = vmatpush3.bf16.msra.mxu1 %v3679_v4  ;;  %v768_v22 = vld [vmem:[%s4552_s3 + $0x48] sm:$0xff]  ;;  %v3737_v23 = vpack.c.bf16 %v796_v16, %v795_v15  ;;  %v785_v24 = vld [vmem:[%s4552_s3 + $0xd0] sm:$0xff]  ;;  %v786_v25 = vld [vmem:[%s4552_s3 + $0xd8] sm:$0xff]  ;;  %v3746_v26 = vpack.c.bf16 %v814_v19, %v813_v18 }
  0x56   : > { %2915 = vmatprep.subr.bf16.mxu1 %v3689_v7  ;;  %v797_v27 = vld [vmem:[%s4552_s3 + $0x130] sm:$0xff]  ;;  %v798_v28 = vld [vmem:[%s4552_s3 + $0x138] sm:$0xff]  ;;  %v3755_v29 = vpack.c.bf16 %v768_v22, %v767_v21  ;;  %v815_v30 = vld [vmem:[%s4552_s3 + $0x1c0] sm:$0xff]  ;;  %v3764_v32 = vpack.c.bf16 %v786_v25, %v785_v24 }
  0x57   : > { %2941 = vmatpush3.bf16.msra.mxu0 %v3701_v11  ;;  %v816_v31 = vld [vmem:[%s4552_s3 + $0x1c8] sm:$0xff]  ;;  %v769_v33 = vld [vmem:[%s4552_s3 + $0x50] sm:$0xff]  ;;  %v770_v34 = vld [vmem:[%s4552_s3 + $0x58] sm:$0xff]  ;;  %v3773_v35 = vpack.c.bf16 %v798_v28, %v797_v27 }
  0x58   : > { %2943 = vmatprep.subr.bf16.mxu0 %v3710_v14  ;;  %v787_v36 = vld [vmem:[%s4552_s3 + $0xe0] sm:$0xff]  ;;  %v788_v37 = vld [vmem:[%s4552_s3 + $0xe8] sm:$0xff]  ;;  %v3782_v38 = vpack.c.bf16 %v816_v31, %v815_v30  ;;  %v3791_v42 = vpack.c.bf16 %v770_v34, %v769_v33  ;;  %v817_v44 = vld [vmem:[%s4552_s3 + $0x1d0] sm:$0xff] }
  0x59   : > { %2917 = vmatpush3.bf16.msra.mxu1 %v3719_v17  ;;  %v799_v40 = vld [vmem:[%s4552_s3 + $0x140] sm:$0xff]  ;;  %v800_v41 = vld [vmem:[%s4552_s3 + $0x148] sm:$0xff]  ;;  %v818_v45 = vld [vmem:[%s4552_s3 + $0x1d8] sm:$0xff]  ;;  %v3800_v46 = vpack.c.bf16 %v788_v37, %v787_v36 }
  0x5a   : > { %2919 = vmatprep.subr.bf16.mxu1 %v3728_v20  ;;  %v771_v48 = vld [vmem:[%s4552_s3 + $0x60] sm:$0xff]  ;;  %v772_v49 = vld [vmem:[%s4552_s3 + $0x68] sm:$0xff]  ;;  %v3810_v53 = vpack.c.bf16 %v800_v41, %v799_v40  ;;  %v789_v54 = vld [vmem:[%s4552_s3 + $0xf0] sm:$0xff]  ;;  %v3819_v57 = vpack.c.bf16 %v818_v45, %v817_v44 }
  0x5b   : > { %2945 = vmatpush3.bf16.msra.mxu0 %v3737_v23  ;;  %v748_v50 = vld [vmem:[%s3579_s20 + $0x8] sm:$0xff]  ;;  %v790_v55 = vld [vmem:[%s4552_s3 + $0xf8] sm:$0xff]  ;;  %v801_v58 = vld [vmem:[%s4552_s3 + $0x150] sm:$0xff]  ;;  %v3828_v61 = vpack.c.bf16 %v772_v49, %v771_v48 }
  0x5c   : > { %2947 = vmatprep.subr.bf16.mxu0 %v3746_v26  ;;  %926 = vmatprep.mubr.f32.mxu1 %v748_v50  ;;  %v802_v59 = vld [vmem:[%s4552_s3 + $0x158] sm:$0xff]  ;;  %v819_v62 = vld [vmem:[%s4552_s3 + $0x1e0] sm:$0xff]  ;;  %v820_v63 = vld [vmem:[%s4552_s3 + $0x1e8] sm:$0xff]  ;;  %v3838_v1 = vpack.c.bf16 %v790_v55, %v789_v54 }
  0x5d   : > { %2921 = vmatpush3.bf16.msra.mxu1 %v3755_v29  ;;  %v750_v0 = vld [vmem:[%s3579_s20 + $0x18] sm:$0xff]  ;;  %v773_v3 = vld [vmem:[%s4552_s3 + $0x70] sm:$0xff]  ;;  %v3847_v6 = vpack.c.bf16 %v802_v59, %v801_v58  ;;  %v839_v8 = vld [vmem:[%s4552_s3 + $0x280] sm:$0xff]  ;;  %v3856_v10 = vpack.c.bf16 %v820_v63, %v819_v62 }
  0x5e   : > { %2923 = vmatprep.subr.bf16.mxu1 %v3764_v32  ;;  %v774_v5 = vld [vmem:[%s4552_s3 + $0x78] sm:$0xff]  ;;  %1001 = vmatprep.mubr.f32.mxu0 %v750_v0  ;;  %v840_v9 = vld [vmem:[%s4552_s3 + $0x288] sm:$0xff]  ;;  %v803_v12 = vld [vmem:[%s4552_s3 + $0x160] sm:$0xff] }
  0x5f   : > { %2949 = vmatpush3.bf16.msra.mxu0 %v3773_v35  ;;  %v804_v13 = vld [vmem:[%s4552_s3 + $0x168] sm:$0xff]  ;;  %v3865_v15 = vpack.c.bf16 %v774_v5, %v773_v3  ;;  %v821_v16 = vld [vmem:[%s4552_s3 + $0x1f0] sm:$0xff]  ;;  %v822_v18 = vld [vmem:[%s4552_s3 + $0x1f8] sm:$0xff]  ;;  %v3874_v19 = vpack.c.bf16 %v840_v9, %v839_v8 }
  0x60   : > { %2951 = vmatprep.subr.bf16.mxu0 %v3782_v38  ;;  %v823_v21 = vld [vmem:[%s4552_s3 + $0x200] sm:$0xff]  ;;  %v824_v22 = vld [vmem:[%s4552_s3 + $0x208] sm:$0xff]  ;;  %v3883_v24 = vpack.c.bf16 %v804_v13, %v803_v12  ;;  %v841_v25 = vld [vmem:[%s4552_s3 + $0x290] sm:$0xff]  ;;  %v3892_v28 = vpack.c.bf16 %v822_v18, %v821_v16 }
  0x61   : > { %2925 = vmatpush3.bf16.msra.mxu1 %v3791_v42  ;;  %v842_v27 = vld [vmem:[%s4552_s3 + $0x298] sm:$0xff]  ;;  %v805_v30 = vld [vmem:[%s4552_s3 + $0x170] sm:$0xff]  ;;  %v747_v33 = vld [vmem:[%s3579_s20] sm:$0xff]  ;;  %v3902_v34 = vpack.c.bf16 %v824_v22, %v823_v21 }
  0x62   : > { %2927 = vmatprep.subr.bf16.mxu1 %v3800_v46  ;;  %v806_v31 = vld [vmem:[%s4552_s3 + $0x178] sm:$0xff]  ;;  %v3905_v36 = vpack.c.bf16 %v842_v27, %v841_v25  ;;  %v825_v37 = vld [vmem:[%s4552_s3 + $0x210] sm:$0xff]  ;;  %v843_v45 = vld [vmem:[%s4552_s3 + $0x2a0] sm:$0xff] }
  0x63   : > { %2953 = vmatpush3.bf16.msra.mxu0 %v3810_v53  ;;  %v826_v40 = vld [vmem:[%s4552_s3 + $0x218] sm:$0xff]  ;;  %v3915_v44 = vpack.c.bf16 %v806_v31, %v805_v30  ;;  %v844_v48 = vld [vmem:[%s4552_s3 + $0x2a8] sm:$0xff]  ;;  %v753_v50 = vld [vmem:[%s3579_s20 + $0x30] sm:$0xff] }
  0x64   : > { %2955 = vmatprep.subr.bf16.mxu0 %v3819_v57  ;;  %v754_v41 = vld [vmem:[%s3579_s20 + $0x38] sm:$0xff]  ;;  %v3925_v49 = vpack.c.bf16 %v826_v40, %v825_v37  ;;  %v3929_v54 = vpack.c.bf16 %v844_v48, %v843_v45  ;;  %v827_v55 = vld [vmem:[%s4552_s3 + $0x220] sm:$0xff]  ;;  %v828_v58 = vld [vmem:[%s4552_s3 + $0x228] sm:$0xff] }
  0x65   : > { %2929 = vmatpush3.bf16.msra.mxu1 %v3828_v61  ;;  %v752_v59 = vld [vmem:[%s3579_s20 + $0x28] sm:$0xff]  ;;  %v749_v62 = vld [vmem:[%s3579_s20 + $0x10] sm:$0xff]  ;;  %v846_v0 = vld [vmem:[%s4552_s3 + $0x2b8] sm:$0xff]  ;;  %v3948_v5 = vpack.c.bf16 %v828_v58, %v827_v55 }
  0x66   : > { %2931 = vmatprep.subr.bf16.mxu1 %v3838_v1  ;;  %v845_v63 = vld [vmem:[%s4552_s3 + $0x2b0] sm:$0xff]  ;;  %v756_v3 = vld [vmem:[%s3579_s20 + $0x48] sm:$0xff]  ;;  %v830_v12 = vld [vmem:[%s4552_s3 + $0x238] sm:$0xff] }
  0x67   : > { %2957 = vmatpush3.bf16.msra.mxu0 %v3847_v6  ;;  %v3951_v8 = vpack.c.bf16 %v846_v0, %v845_v63  ;;  %v829_v9 = vld [vmem:[%s4552_s3 + $0x230] sm:$0xff]  ;;  %v847_v13 = vld [vmem:[%s4552_s3 + $0x2c0] sm:$0xff]  ;;  %v848_v16 = vld [vmem:[%s4552_s3 + $0x2c8] sm:$0xff] }
  0x68   : > { %2959 = vmatprep.subr.bf16.mxu0 %v3856_v10  ;;  %v755_v18 = vld [vmem:[%s3579_s20 + $0x40] sm:$0xff]  ;;  %v3967_v21 = vpack.c.bf16 %v830_v12, %v829_v9  ;;  %v3970_v22 = vpack.c.bf16 %v848_v16, %v847_v13  ;;  %v832_v27 = vld [vmem:[%s4552_s3 + $0x248] sm:$0xff]  ;;  %v849_v30 = vld [vmem:[%s4552_s3 + $0x2d0] sm:$0xff] }
  0x69   : > { %2933 = vmatpush3.bf16.msra.mxu1 %v3865_v15  ;;  %v831_v25 = vld [vmem:[%s4552_s3 + $0x240] sm:$0xff]  ;;  %v850_v31 = vld [vmem:[%s4552_s3 + $0x2d8] sm:$0xff]  ;;  %v833_v40 = vld [vmem:[%s4552_s3 + $0x250] sm:$0xff] }
  0x6a   : > { %2967 = vmatprep.subr.bf16.mxu1 %v3874_v19  ;;  %v3988_v37 = vpack.c.bf16 %v850_v31, %v849_v30  ;;  %v851_v45 = vld [vmem:[%s4552_s3 + $0x2e0] sm:$0xff]  ;;  %v852_v48 = vld [vmem:[%s4552_s3 + $0x2e8] sm:$0xff]  ;;  %v854_v63 = vld [vmem:[%s4552_s3 + $0x2f8] sm:$0xff] }
  0x6b   : > { %2961 = vmatpush3.bf16.msra.mxu0 %v3883_v24  ;;  %v4006_v55 = vpack.c.bf16 %v852_v48, %v851_v45  ;;  %v835_v58 = vld [vmem:[%s4552_s3 + $0x260] sm:$0xff]  ;;  %v837_v9 = vld [vmem:[%s4552_s3 + $0x270] sm:$0xff]  ;;  %v838_v12 = vld [vmem:[%s4552_s3 + $0x278] sm:$0xff] }
  0x6c   : > { %927 = vmatmul.mubr.f32.vlgmr.msra.gmra.mrb[0].mxu1 %v747_v33  ;;  %2963 = vmatprep.subr.bf16.mxu0 %v3892_v28  ;;  %v3985_v33 = vpack.c.bf16 %v832_v27, %v831_v25  ;;  %v4033_v13 = vpack.c.bf16 %v838_v12, %v837_v9  ;;  %v751_v16 = vld [vmem:[%s3579_s20 + $0x20] sm:$0xff]  ;;  %v757_v25 = vld [vmem:[%s3579_s20 + $0x50] sm:$0xff]  ;;  %v1090_v30 = vld [vmem:[%s4557_s8 + $0x8] sm:$0xff] }
  0x6d   : > { %2969 = vmatpush3.bf16.msra.mxu1 %v3902_v34  ;;  %931 = vmatprep.mubr.f32.mxu1 %v754_v41  ;;  %v834_v41 = vld [vmem:[%s4552_s3 + $0x258] sm:$0xff]  ;;  %v1089_v27 = vld [vmem:[%s4557_s8] sm:$0xff]  ;;  %vm4052_vm4 = vmpackc.low %vm1100_vm2, %vm3351_vm3 }
  0x6e   : > { %2971 = vmatprep.subr.bf16.mxu1 %v3905_v36  ;;  %v2998_v31 = vpack.c.bf16 %v1090_v30, %v1089_v27  ;;  %v1243_v9 = vld [vmem:[%s4554_s5 + $0x188] sm:$0xff]  ;;  %v1244_v27 = vld [vmem:[%s4554_s5 + $0x190] sm:$0xff]  ;;  %v1245_v30 = vld [vmem:[%s4554_s5 + $0x198] sm:$0xff] }
  0x6f   : > { %2965 = vmatpush3.bf16.msra.mxu0 %v3915_v44 }
  0x70   : > { %932 = vmatmul.mubr.f32.gmra.mrb[2].mxu1 %v753_v50  ;;  %v4003_v50 = vpack.c.bf16 %v834_v41, %v833_v40  ;;  %2999 = vmatprep.subr.bf16.mxu0 %v2998_v31  ;;  %v1091_v40 = vld [vmem:[%s4557_s8 + $0x10] sm:$0xff]  ;;  %v1092_v41 = vld [vmem:[%s4557_s8 + $0x18] sm:$0x3f] }
  0x71   : > { %2973 = vmatpush3.bf16.msra.mxu1 %v3925_v49  ;;  %1076 = vmatprep.mubr.f32.mxu1 %v752_v59  ;;  %v836_v59 = vld [vmem:[%s4552_s3 + $0x268] sm:$0xff]  ;;  %v3002_v45 = vpack.c.bf16 %v1092_v41, %v1091_v40  ;;  %v1228_v40 = vld [vmem:[%s4554_s5 + $0x110] sm:$0xff]  ;;  %v1229_v41 = vld [vmem:[%s4554_s5 + $0x118] sm:$0xff] }
  0x72   : > { %1002 = vmatmul.mubr.f32.vlgmr.msra.gmra.mrb[2].mxu0 %v749_v62  ;;  %2975 = vmatprep.subr.bf16.mxu1 %v3929_v54  ;;  %v853_v62 = vld [vmem:[%s4552_s3 + $0x2f0] sm:$0xff]  ;;  %v4021_v0 = vpack.c.bf16 %v836_v59, %v835_v58  ;;  %v1210_v58 = vld [vmem:[%s4554_s5 + $0x80] sm:$0xff]  ;;  %v1211_v59 = vld [vmem:[%s4554_s5 + $0x88] sm:$0xff] }
  0x73   : > { %1006 = vmatprep.mubr.f32.mxu0 %v756_v3  ;;  %v4024_v3 = vpack.c.bf16 %v854_v63, %v853_v62  ;;  %3001 = vmatpush3.bf16.msra.mxu0 %v2998_v31  ;;  %v3008_v62 = vpack.c.bf16 %v1211_v59, %v1210_v58  ;;  %v1242_v63 = vld [vmem:[%s4554_s5 + $0x180] sm:$0xff]  ;;  %v3044_v31 = vpack.c.bf16 %v1245_v30, %v1244_v27  ;;  %v1247_v59 = vld [vmem:[%s4554_s5 + $0x1a8] sm:$0xff]  ;;  %v1232_v27 = vld [vmem:[%s4554_s5 + $0x130] sm:$0xff] }
  0x74   : > { %3004 = vmatprep.subr.msk.bf16.mxu0 %vm4052_vm4, %v3002_v45  ;;  %v3040_v12 = vpack.c.bf16 %v1243_v9, %v1242_v63  ;;  %v1246_v58 = vld [vmem:[%s4554_s5 + $0x1a0] sm:$0xff]  ;;  %v1231_v9 = vld [vmem:[%s4554_s5 + $0x128] sm:$0xff]  ;;  %v1233_v30 = vld [vmem:[%s4554_s5 + $0x138] sm:$0xff] }
  0x75   : > { %2977 = vmatpush3.bf16.msra.mxu1 %v3948_v5  ;;  %v1230_v63 = vld [vmem:[%s4554_s5 + $0x120] sm:$0xff] }
  0x76   : > { %2979 = vmatprep.subr.bf16.mxu1 %v3951_v8  ;;  %1007 = vmatmul.mubr.f32.gmra.mrb[4].mxu0 %v755_v18  ;;  %v758_v18 = vld [vmem:[%s3579_s20 + $0x58] sm:$0xff] }
  0x77   : > { %3007 = vmatpush3.bf16.msk.msra.mxu0 %vm4052_vm4, %v3002_v45  ;;  %v3046_v45 = vpack.c.bf16 %v1229_v41, %v1228_v40  ;;  %v1250_v40 = vld [vmem:[%s4554_s5 + $0x1c0] sm:$0xff]  ;;  %v1251_v41 = vld [vmem:[%s4554_s5 + $0x1c8] sm:$0xff] }
  0x78   : > { %3009 = vmatprep.subr.bf16.mxu0 %v3008_v62  ;;  %v3048_v62 = vpack.c.bf16 %v1247_v59, %v1246_v58  ;;  %v1234_v58 = vld [vmem:[%s4554_s5 + $0x140] sm:$0xff]  ;;  %v1235_v59 = vld [vmem:[%s4554_s5 + $0x148] sm:$0xff] }
  0x79   : > { %2981 = vmatpush3.bf16.msra.mxu1 %v3967_v21 }
  0x7a   : > { %2983 = vmatprep.subr.bf16.mxu1 %v3970_v22 }
  0x7d   : > { %2985 = vmatpush3.bf16.msra.mxu1 %v3985_v33 }
  0x7e   : > { %2987 = vmatprep.subr.bf16.mxu1 %v3988_v37 }
  0x81   : > { %2989 = vmatpush3.bf16.msra.mxu1 %v4003_v50 }
  0x82   : > { %2991 = vmatprep.subr.bf16.mxu1 %v4006_v55 }
  0x85   : > { %2993 = vmatpush3.bf16.msra.mxu1 %v4021_v0 }
  0x86   : > { %2995 = vmatprep.subr.bf16.mxu1 %v4024_v3 }
  0x89   : > { %2997 = vmatpush3.bf16.msra.mxu1 %v4033_v13 }
  0x8a   : > { %3041 = vmatprep.subr.bf16.mxu1 %v3040_v12  ;;  %v3050_v12 = vpack.c.bf16 %v1231_v9, %v1230_v63  ;;  %v1252_v63 = vld [vmem:[%s4554_s5 + $0x1d0] sm:$0xff]  ;;  %v1253_v9 = vld [vmem:[%s4554_s5 + $0x1d8] sm:$0xff] }
  0x8c   : > { %1077 = vmatmul.mubr.f32.vlgmr.msra.gmra.mrb[4].mxu1 %v751_v16  ;;  %v1226_v16 = vld [vmem:[%s4554_s5 + $0x100] sm:$0xff] }
  0x8d   : > { %1081 = vmatprep.mubr.f32.mxu1 %v758_v18  ;;  %v1227_v18 = vld [vmem:[%s4554_s5 + $0x108] sm:$0xff] }
  0x90   : > { %1082 = vmatmul.mubr.f32.gmra.mrb[6].mxu1 %v757_v25  ;;  %v3042_v25 = vpack.c.bf16 %v1227_v18, %v1226_v16  ;;  %v1248_v16 = vld [vmem:[%s4554_s5 + $0x1b0] sm:$0xff]  ;;  %v1249_v18 = vld [vmem:[%s4554_s5 + $0x1b8] sm:$0xff] }
  0x92   : > { %3043 = vmatpush3.bf16.msra.mxu1 %v3042_v25  ;;  %v3052_v25 = vpack.c.bf16 %v1249_v18, %v1248_v16  ;;  %v1236_v16 = vld [vmem:[%s4554_s5 + $0x150] sm:$0xff]  ;;  %v1237_v18 = vld [vmem:[%s4554_s5 + $0x158] sm:$0xff] }
  0x93   : > { %3045 = vmatprep.subr.bf16.mxu1 %v3044_v31  ;;  %v3054_v31 = vpack.c.bf16 %v1233_v30, %v1232_v27  ;;  %v1254_v27 = vld [vmem:[%s4554_s5 + $0x1e0] sm:$0xff]  ;;  %v1255_v30 = vld [vmem:[%s4554_s5 + $0x1e8] sm:$0xff] }
  0x96   : > { %3047 = vmatpush3.bf16.msra.mxu1 %v3046_v45  ;;  %v3056_v45 = vpack.c.bf16 %v1251_v41, %v1250_v40  ;;  %v1238_v40 = vld [vmem:[%s4554_s5 + $0x160] sm:$0xff]  ;;  %v1239_v41 = vld [vmem:[%s4554_s5 + $0x168] sm:$0xff] }
  0x97   : > { %3049 = vmatprep.subr.bf16.mxu1 %v3048_v62  ;;  %v3058_v62 = vpack.c.bf16 %v1235_v59, %v1234_v58  ;;  %v1256_v58 = vld [vmem:[%s4554_s5 + $0x1f0] sm:$0xff]  ;;  %v1257_v59 = vld [vmem:[%s4554_s5 + $0x1f8] sm:$0xff] }
  0x9a   : > { %3051 = vmatpush3.bf16.msra.mxu1 %v3050_v12  ;;  %v3060_v12 = vpack.c.bf16 %v1253_v9, %v1252_v63  ;;  %v1240_v63 = vld [vmem:[%s4554_s5 + $0x170] sm:$0xff]  ;;  %v1241_v9 = vld [vmem:[%s4554_s5 + $0x178] sm:$0xff] }
  0x9b   : > { %3053 = vmatprep.subr.bf16.mxu1 %v3052_v25  ;;  %v3062_v25 = vpack.c.bf16 %v1237_v18, %v1236_v16  ;;  %v2389_v16 = vld [vmem:[%s3579_s20 + $0x78] sm:$0xff]  ;;  %v2388_v18 = vld [vmem:[%s3579_s20 + $0x70] sm:$0xff] }
  0x9c   : > { %1436 = vmatprep.mubr.f32.mxu1 %v2389_v16  ;;  %v1213_v16 = vld [vmem:[%s4554_s5 + $0x98] sm:$0xff] }
  0x9e   : > { %3055 = vmatpush3.bf16.msra.mxu1 %v3054_v31  ;;  %v3064_v31 = vpack.c.bf16 %v1255_v30, %v1254_v27 }
  0x9f   : > { %3057 = vmatprep.subr.bf16.mxu1 %v3056_v45  ;;  %v3066_v45 = vpack.c.bf16 %v1239_v41, %v1238_v40 }
  0xa2   : > { %3059 = vmatpush3.bf16.msra.mxu1 %v3058_v62  ;;  %v3068_v62 = vpack.c.bf16 %v1257_v59, %v1256_v58 }
  0xa3   : > { %3061 = vmatprep.subr.bf16.mxu1 %v3060_v12  ;;  %v3070_v12 = vpack.c.bf16 %v1241_v9, %v1240_v63  ;;  %v1194_v63 = vld [vmem:[%s4554_s5] sm:$0xff]  ;;  %v1195_v9 = vld [vmem:[%s4554_s5 + $0x8] sm:$0xff] }
  0xa6   : > { %3063 = vmatpush3.bf16.msra.mxu1 %v3062_v25 }
  0xa7   : > { %3065 = vmatprep.subr.bf16.mxu1 %v3064_v31 }
  0xaa   : > { %3067 = vmatpush3.bf16.msra.mxu1 %v3066_v45 }
  0xab   : > { %3069 = vmatprep.subr.bf16.mxu1 %v3068_v62 }
  0xae   : > { %3071 = vmatpush3.bf16.msra.mxu1 %v3070_v12  ;;  %v1212_v12 = vld [vmem:[%s4554_s5 + $0x90] sm:$0xff] }
  0xaf   : > { %3115 = vmatprep.subr.bf16.mxu1 %v3592_v39  ;;  %v2395_v39 = vld [vmem:[%s3579_s20 + $0xa8] sm:$0xff] }
  0xb1   : > { %1437 = vmatmul.mubr.f32.vlgmr.msra.gmra.mrb[8].mxu1 %v2388_v18 }
  0xb2   : > { %3117 = vmatpush3.bf16.msra.mxu1 %v3603_v43  ;;  %1441 = vmatprep.mubr.f32.mxu1 %v2395_v39  ;;  %v2394_v43 = vld [vmem:[%s3579_s20 + $0xa0] sm:$0xff]  ;;  %v3010_v39 = vpack.c.bf16 %v1195_v9, %v1194_v63 }
  0xb3   : > { %3119 = vmatprep.subr.bf16.mxu1 %v3615_v47 }
  0xb5   : > { %1442 = vmatmul.mubr.f32.gmra.mrb[10].mxu1 %v2394_v43 }
  0xb6   : > { %3121 = vmatpush3.bf16.msra.mxu1 %v3629_v51 }
  0xb7   : > { %3123 = vmatprep.subr.bf16.mxu1 %v3644_v56 }
  0xba   : > { %3125 = vmatpush3.bf16.msra.mxu1 %v3679_v4 }
  0xbb   : > { %3127 = vmatprep.subr.bf16.mxu1 %v3689_v7  ;;  %v4186_v7 = vld [vmem:[%s4553_s4] ss:$0 sm:$0xff] }
  0xbe   : > { %3129 = vmatpush3.bf16.msra.mxu1 %v3719_v17 }
  0xbf   : > { %3131 = vmatprep.subr.bf16.mxu1 %v3728_v20 }
  0xc2   : > { %3133 = vmatpush3.bf16.msra.mxu1 %v3755_v29 }
  0xc3   : > { %3135 = vmatprep.subr.bf16.mxu1 %v3764_v32 }
  0xc6   : > { %3137 = vmatpush3.bf16.msra.mxu1 %v3791_v42 }
  0xc7   : > { %3139 = vmatprep.subr.bf16.mxu1 %v3800_v46 }
  0xca   : > { %3141 = vmatpush3.bf16.msra.mxu1 %v3828_v61 }
  0xcb   : > { %3143 = vmatprep.subr.bf16.mxu1 %v3838_v1 }
  0xce   : > { %3145 = vmatpush3.bf16.msra.mxu1 %v3865_v15 }
  0xcf   : > { %3179 = vmatprep.subr.bf16.mxu1 %v3874_v19 }
 0x13f   : > { %v2473_v47 = vpop.f32.mrb[0].mxu1 }
 0x140   : > { %v2474_v51 = vpop.f32.mrb[1].mxu1 }
 0x141   : > { %v2475_v56 = vadd.f32 %v2474_v51, %v2473_v47  ;;  %v3012_v47 = vpack.c.bf16 %v1213_v16, %v1212_v12  ;;  %v1196_v51 = vld [vmem:[%s4554_s5 + $0x10] sm:$0xff]  ;;  %v1205_v16 = vld [vmem:[%s4554_s5 + $0x58] sm:$0xff] }
 0x142   : > { %v1204_v12 = vld [vmem:[%s4554_s5 + $0x50] sm:$0xff] }
 0x143   : > { %v2476_v4 = vpop.f32.mrb[2].mxu1  ;;  %v929_v42 = vadd.f32 %v2475_v56, %v4186_v7  ;;  %v1197_v56 = vld [vmem:[%s4554_s5 + $0x18] sm:$0xff] }
 0x144   : > { %v2477_v17 = vpop.f32.mrb[3].mxu1 }
 0x145   : > { %v2511_v20 = vpop.f32.mrb[2].mxu0  ;;  %v2478_v29 = vadd.f32 %v2477_v17, %v2476_v4  ;;  %v2387_v4 = vld [vmem:[%s3579_s20 + $0x68] sm:$0xff]  ;;  %v1214_v17 = vld [vmem:[%s4554_s5 + $0xa0] sm:$0xff] }
 0x146   : > { %v2512_v32 = vpop.f32.mrb[3].mxu0 }
 0x147   : > { %v2513_v46 = vadd.f32 %v2512_v32, %v2511_v20  ;;  %v934_v1 = vadd.f32 %v2478_v29, %v4186_v7  ;;  %v1215_v20 = vld [vmem:[%s4554_s5 + $0xa8] sm:$0xff]  ;;  %v3014_v29 = vpack.c.bf16 %v1197_v56, %v1196_v51  ;;  %v1206_v51 = vld [vmem:[%s4554_s5 + $0x60] sm:$0xff] }
 0x148   : > { %v3016_v32 = vpack.c.bf16 %v1215_v20, %v1214_v17  ;;  %v1207_v56 = vld [vmem:[%s4554_s5 + $0x68] sm:$0xff]  ;;  %v1225_v17 = vld [vmem:[%s4554_s5 + $0xf8] sm:$0xff] }
 0x149   : > { %v1004_v61 = vadd.f32 %v2513_v46, %v929_v42  ;;  %v2514_v15 = vpop.f32.mrb[4].mxu0  ;;  %v1198_v42 = vld [vmem:[%s4554_s5 + $0x20] sm:$0xff]  ;;  %v1199_v46 = vld [vmem:[%s4554_s5 + $0x28] sm:$0xff]  ;;  %v3034_v20 = vpack.c.bf16 %v1207_v56, %v1206_v51  ;;  %v1281_v51 = vld [vmem:[%s4554_s5 + $0x2b8] sm:$0xff] }
 0x14a   : > { %v2515_v19 = vpop.f32.mrb[5].mxu0 }
 0x14b   : > { %v2516_v25 = vadd.f32 %v2515_v19, %v2514_v15  ;;  %v3018_v15 = vpack.c.bf16 %v1199_v46, %v1198_v42  ;;  %v1209_v42 = vld [vmem:[%s4554_s5 + $0x78] sm:$0xff]  ;;  %v1274_v46 = vld [vmem:[%s4554_s5 + $0x280] sm:$0xff] }
 0x14d   : > { %v1009_v27 = vadd.f32 %v2516_v25, %v934_v1  ;;  %v1217_v1 = vld [vmem:[%s4554_s5 + $0xb8] sm:$0xff]  ;;  %v1200_v25 = vld [vmem:[%s4554_s5 + $0x30] sm:$0xff] }
 0x15f   : > { %v2549_v30 = vpop.f32.mrb[4].mxu1 }
 0x160   : > { %v2550_v31 = vpop.f32.mrb[5].mxu1 }
 0x161   : > { %v2551_v40 = vadd.f32 %v2550_v31, %v2549_v30  ;;  %v1218_v30 = vld [vmem:[%s4554_s5 + $0xc0] sm:$0xff]  ;;  %v1219_v31 = vld [vmem:[%s4554_s5 + $0xc8] sm:$0xff] }
 0x163   : > { %v1079_v41 = vadd.f32 %v2551_v40, %v1004_v61  ;;  %v2552_v45 = vpop.f32.mrb[6].mxu1  ;;  %v1216_v61 = vld [vmem:[%s4554_s5 + $0xb0] sm:$0xff] }
 0x164   : > { %v2553_v58 = vpop.f32.mrb[7].mxu1  ;;  %v3020_v19 = vpack.c.bf16 %v1217_v1, %v1216_v61  ;;  %v1275_v61 = vld [vmem:[%s4554_s5 + $0x288] sm:$0xff] }
 0x165   : > { %v1087_v59 = vmax.f32 %v1079_v41, 0.0  ;;  %v2554_v62 = vadd.f32 %v2553_v58, %v2552_v45  ;;  %v3024_v41 = vpack.c.bf16 %v1219_v31, %v1218_v30  ;;  %v1202_v45 = vld [vmem:[%s4554_s5 + $0x40] sm:$0xff]  ;;  %v1203_v58 = vld [vmem:[%s4554_s5 + $0x48] sm:$0xff]  ;;  %v1277_v30 = vld [vmem:[%s4554_s5 + $0x298] sm:$0xff] }
 0x166   : > { %v3026_v63 = vpack.c.bf16 %v1203_v58, %v1202_v45  ;;  %v2386_v31 = vld [vmem:[%s3579_s20 + $0x60] sm:$0xff]  ;;  %v1260_v45 = vld [vmem:[%s4554_s5 + $0x210] sm:$0xff]  ;;  %v1261_v58 = vld [vmem:[%s4554_s5 + $0x218] sm:$0xff] }
 0x167   : > { %v1084_v18 = vadd.f32 %v2554_v62, %v1009_v27  ;;  %2836 = vmatprep.mubr.msk.f32.mxu0 %vm1093_vm5, %v1087_v59  ;;  %v1201_v27 = vld [vmem:[%s4554_s5 + $0x38] sm:$0xff]  ;;  %v1220_v59 = vld [vmem:[%s4554_s5 + $0xd0] sm:$0xff] }
 0x168   : > { %v3022_v40 = vpack.c.bf16 %v1201_v27, %v1200_v25  ;;  %v1221_v62 = vld [vmem:[%s4554_s5 + $0xd8] sm:$0xff]  ;;  %v1259_v25 = vld [vmem:[%s4554_s5 + $0x208] sm:$0xff]  ;;  %v1276_v27 = vld [vmem:[%s4554_s5 + $0x290] sm:$0xff] }
 0x169   : > { %v1088_v43 = vmax.f32 %v1084_v18, 0.0  ;;  %v3028_v9 = vpack.c.bf16 %v1221_v62, %v1220_v59  ;;  %v1222_v18 = vld [vmem:[%s4554_s5 + $0xe0] sm:$0xff]  ;;  %v2393_v59 = vld [vmem:[%s3579_s20 + $0x98] sm:$0xff] }
 0x16a   : > { %v1278_v62 = vld [vmem:[%s4554_s5 + $0x2a0] sm:$0xff] }
 0x16b   : > { %2837 = vmatmul.mubr.msk.f32.vlgmr.msra.gmra.mrb[0].mxu0 %vm1093_vm5, %v1088_v43  ;;  %v3030_v43 = vpack.c.bf16 %v1205_v16, %v1204_v12  ;;  %v2392_v12 = vld [vmem:[%s3579_s20 + $0x90] sm:$0xff] }
 0x16c   : > { %3011 = vmatpush3.bf16.msra.mxu0 %v3010_v39  ;;  %1361 = vmatprep.mubr.f32.mxu0 %v2387_v4  ;;  %v1223_v39 = vld [vmem:[%s4554_s5 + $0xe8] sm:$0xff]  ;;  %v1224_v4 = vld [vmem:[%s4554_s5 + $0xf0] sm:$0xff] }
 0x16d   : > { %3013 = vmatprep.subr.bf16.mxu0 %v3012_v47  ;;  %v3032_v47 = vpack.c.bf16 %v1223_v39, %v1222_v18  ;;  %v1262_v18 = vld [vmem:[%s4554_s5 + $0x220] sm:$0xff]  ;;  %v1263_v39 = vld [vmem:[%s4554_s5 + $0x228] sm:$0xff] }
 0x16e   : > { %v3082_v56 = vpack.c.bf16 %v1263_v39, %v1262_v18  ;;  %v1272_v18 = vld [vmem:[%s4554_s5 + $0x270] sm:$0xff]  ;;  %v1273_v39 = vld [vmem:[%s4554_s5 + $0x278] sm:$0xff] }
 0x170   : > { %3015 = vmatpush3.bf16.msra.mxu0 %v3014_v29  ;;  %v3036_v29 = vpack.c.bf16 %v1225_v17, %v1224_v4  ;;  %v1264_v17 = vld [vmem:[%s4554_s5 + $0x230] sm:$0xff] }
 0x171   : > { %3017 = vmatprep.subr.bf16.mxu0 %v3016_v32  ;;  %v1208_v32 = vld [vmem:[%s4554_s5 + $0x70] sm:$0xff] }
 0x172   : > { %v3038_v1 = vpack.c.bf16 %v1209_v42, %v1208_v32  ;;  %v1283_v32 = vld [vmem:[%s4554_s5 + $0x2c8] sm:$0xff] }
 0x174   : > { %3019 = vmatpush3.bf16.msra.mxu0 %v3018_v15  ;;  %v3072_v15 = vpack.c.bf16 %v1275_v61, %v1274_v46  ;;  %v1266_v61 = vld [vmem:[%s4554_s5 + $0x240] sm:$0xff] }
 0x175   : > { %3021 = vmatprep.subr.bf16.mxu0 %v3020_v19  ;;  %v1258_v19 = vld [vmem:[%s4554_s5 + $0x200] sm:$0xff] }
 0x178   : > { %3023 = vmatpush3.bf16.msra.mxu0 %v3022_v40  ;;  %v3074_v40 = vpack.c.bf16 %v1259_v25, %v1258_v19  ;;  %v1285_v19 = vld [vmem:[%s4554_s5 + $0x2d8] sm:$0xff] }
 0x179   : > { %3025 = vmatprep.subr.bf16.mxu0 %v3024_v41  ;;  %v3076_v41 = vpack.c.bf16 %v1277_v30, %v1276_v27  ;;  %v1268_v30 = vld [vmem:[%s4554_s5 + $0x250] sm:$0xff] }
 0x17c   : > { %3027 = vmatpush3.bf16.msra.mxu0 %v3026_v63  ;;  %v1279_v63 = vld [vmem:[%s4554_s5 + $0x2a8] sm:$0xff] }
 0x17d   : > { %3029 = vmatprep.subr.bf16.mxu0 %v3028_v9  ;;  %v3078_v9 = vpack.c.bf16 %v1261_v58, %v1260_v45  ;;  %v3080_v16 = vpack.c.bf16 %v1279_v63, %v1278_v62  ;;  %v1271_v62 = vld [vmem:[%s4554_s5 + $0x268] sm:$0xff]  ;;  %v1288_v63 = vld [vmem:[%s4554_s5 + $0x2f0] sm:$0xff] }
 0x180   : > { %3031 = vmatpush3.bf16.msra.mxu0 %v3030_v43  ;;  %v2391_v43 = vld [vmem:[%s3579_s20 + $0x88] sm:$0xff] }
 0x181   : > { %3033 = vmatprep.subr.bf16.mxu0 %v3032_v47  ;;  %v1280_v47 = vld [vmem:[%s4554_s5 + $0x2b0] sm:$0xff] }
 0x182   : > { %v3084_v4 = vpack.c.bf16 %v1281_v51, %v1280_v47  ;;  %v2390_v47 = vld [vmem:[%s3579_s20 + $0x80] sm:$0xff]  ;;  %v2397_v51 = vld [vmem:[%s3579_s20 + $0xb8] sm:$0xff] }
 0x184   : > { %3035 = vmatpush3.bf16.msra.mxu0 %v3034_v20  ;;  %v1265_v20 = vld [vmem:[%s4554_s5 + $0x238] sm:$0xff] }
 0x185   : > { %3037 = vmatprep.subr.bf16.mxu0 %v3036_v29  ;;  %v1282_v29 = vld [vmem:[%s4554_s5 + $0x2c0] sm:$0xff]  ;;  %v3086_v42 = vpack.c.bf16 %v1265_v20, %v1264_v17 }
 0x186   : > { %v3088_v46 = vpack.c.bf16 %v1283_v32, %v1282_v29 }
 0x188   : > { %3039 = vmatpush3.bf16.msra.mxu0 %v3038_v1  ;;  %v1267_v1 = vld [vmem:[%s4554_s5 + $0x248] sm:$0xff] }
 0x189   : > { %3073 = vmatprep.subr.bf16.mxu0 %v3072_v15  ;;  %v1284_v15 = vld [vmem:[%s4554_s5 + $0x2d0] sm:$0xff]  ;;  %v3090_v25 = vpack.c.bf16 %v1267_v1, %v1266_v61  ;;  %v2400_v61 = vld [vmem:[%s4557_s8 + $0x28] sm:$0xff] }
 0x18a   : > { %v3092_v27 = vpack.c.bf16 %v1285_v19, %v1284_v15  ;;  %v2401_v15 = vld [vmem:[%s4557_s8 + $0x30] sm:$0xff]  ;;  %v2402_v19 = vld [vmem:[%s4557_s8 + $0x38] sm:$0x3f] }
 0x18b   : > { %1362 = vmatmul.mubr.f32.vlgmr.msra.gmra.mrb[6].mxu0 %v2386_v31  ;;  %v1269_v31 = vld [vmem:[%s4554_s5 + $0x258] sm:$0xff] }
 0x18c   : > { %3075 = vmatpush3.bf16.msra.mxu0 %v3074_v40  ;;  %1366 = vmatprep.mubr.f32.mxu0 %v2393_v59  ;;  %v1286_v40 = vld [vmem:[%s4554_s5 + $0x2e0] sm:$0xff]  ;;  %v3094_v45 = vpack.c.bf16 %v1269_v31, %v1268_v30 }
 0x18d   : > { %3077 = vmatprep.subr.bf16.mxu0 %v3076_v41  ;;  %v1287_v41 = vld [vmem:[%s4554_s5 + $0x2e8] sm:$0xff]  ;;  %v1270_v59 = vld [vmem:[%s4554_s5 + $0x260] sm:$0xff] }
 0x18e   : > { %v3096_v58 = vpack.c.bf16 %v1287_v41, %v1286_v40  ;;  %v2406_v30 = vld [vmem:[%s3579_s20 + $0xc0] sm:$0xff] }
 0x18f   : > { %1367 = vmatmul.mubr.f32.gmra.mrb[8].mxu0 %v2392_v12  ;;  %v3098_v12 = vpack.c.bf16 %v1271_v62, %v1270_v59 }
 0x190   : > { %3079 = vmatpush3.bf16.msra.mxu0 %v3078_v9  ;;  %1511 = vmatprep.mubr.f32.mxu0 %v2391_v43  ;;  %v1289_v9 = vld [vmem:[%s4554_s5 + $0x2f8] sm:$0xff]  ;;  %v3102_v43 = vpack.c.bf16 %v1273_v39, %v1272_v18 }
 0x191   : > { %3081 = vmatprep.subr.bf16.mxu0 %v3080_v16  ;;  %v3100_v16 = vpack.c.bf16 %v1289_v9, %v1288_v63  ;;  %v2409_v18 = vld [vmem:[%s3579_s20 + $0xd8] sm:$0xff] }
 0x194   : > { %3083 = vmatpush3.bf16.msra.mxu0 %v3082_v56  ;;  %v2396_v56 = vld [vmem:[%s3579_s20 + $0xb0] sm:$0xff] }
 0x195   : > { %3085 = vmatprep.subr.bf16.mxu0 %v3084_v4  ;;  %v2631_v4 = vpop.f32.mrb[8].mxu1 }
 0x196   : > { %v2632_v17 = vpop.f32.mrb[9].mxu1 }
 0x197   : > { %v2633_v20 = vadd.f32 %v2632_v17, %v2631_v4  ;;  %v2634_v29 = vpop.f32.mrb[10].mxu1  ;;  %v1956_v17 = vld [vmem:[%s4559_s10] sm:$0xff] }
 0x198   : > { %3087 = vmatpush3.bf16.msra.mxu0 %v3086_v42  ;;  %v2635_v32 = vpop.f32.mrb[11].mxu1 }
 0x199   : > { %3089 = vmatprep.subr.bf16.mxu0 %v3088_v46  ;;  %v2636_v42 = vadd.f32 %v2635_v32, %v2634_v29  ;;  %v2399_v46 = vld [vmem:[%s4557_s8 + $0x20] sm:$0xff] }
 0x19a   : > { %v3104_v1 = vpack.c.bf16 %v2400_v61, %v2399_v46 }
 0x19c   : > { %3091 = vmatpush3.bf16.msra.mxu0 %v3090_v25  ;;  %v3108_v25 = vpack.c.bf16 %v2402_v19, %v2401_v15 }
 0x19d   : > { %3093 = vmatprep.subr.bf16.mxu0 %v3092_v27  ;;  %v2407_v27 = vld [vmem:[%s3579_s20 + $0xc8] sm:$0xff] }
 0x19e   : > { %1692 = vmatprep.mubr.f32.mxu1 %v2407_v27 }
 0x19f   : > { %1693 = vmatmul.mubr.f32.vlgmr.msra.gmra.mrb[12].mxu1 %v2406_v30 }
 0x1a0   : > { %3095 = vmatpush3.bf16.msra.mxu0 %v3094_v45  ;;  %3181 = vmatpush3.bf16.msra.mxu1 %v3902_v34  ;;  %v2412_v34 = vld [vmem:[%s3579_s20 + $0xf0] sm:$0xff] }
 0x1a1   : > { %3097 = vmatprep.subr.bf16.mxu0 %v3096_v58  ;;  %3183 = vmatprep.subr.bf16.mxu1 %v3905_v36  ;;  %v2411_v36 = vld [vmem:[%s3579_s20 + $0xe8] sm:$0xff] }
 0x1a4   : > { %3099 = vmatpush3.bf16.msra.mxu0 %v3098_v12  ;;  %3185 = vmatpush3.bf16.msra.mxu1 %v3925_v49  ;;  %v2410_v49 = vld [vmem:[%s3579_s20 + $0xe0] sm:$0xff] }
 0x1a5   : > { %3101 = vmatprep.subr.bf16.mxu0 %v3100_v16  ;;  %3187 = vmatprep.subr.bf16.mxu1 %v3929_v54  ;;  %v2417_v54 = vld [vmem:[%s3579_s20 + $0x118] sm:$0xff] }
 0x1a8   : > { %3103 = vmatpush3.bf16.msra.mxu0 %v3102_v43  ;;  %3189 = vmatpush3.bf16.msra.mxu1 %v3948_v5  ;;  %v2416_v5 = vld [vmem:[%s3579_s20 + $0x110] sm:$0xff] }
 0x1a9   : > { %3105 = vmatprep.subr.bf16.mxu0 %v3104_v1  ;;  %3191 = vmatprep.subr.bf16.mxu1 %v3951_v8 }
 0x1ab   : > { %1512 = vmatmul.mubr.f32.vlgmr.msra.gmra.mrb[10].mxu0 %v2390_v47  ;;  %v2420_v47 = vld [vmem:[%s4557_s8 + $0x50] sm:$0xff] }
 0x1ac   : > { %1516 = vmatprep.mubr.f32.mxu0 %v2397_v51  ;;  %3107 = vmatpush3.bf16.msra.mxu0 %v3104_v1  ;;  %v2421_v51 = vld [vmem:[%s4557_s8 + $0x58] sm:$0x3f] }
 0x1ad   : > { %3110 = vmatprep.subr.msk.bf16.mxu0 %vm4052_vm4, %v3108_v25  ;;  %3193 = vmatpush3.bf16.msra.mxu1 %v3967_v21  ;;  %v2398_v21 = vld [vmem:[%s4555_s6] ss:$0 sm:$0xff]  ;;  %v3214_v4 = vpack.c.bf16 %v2421_v51, %v2420_v47  ;;  %v2167_v51 = vld [vmem:[%s4563_s14 + $0x8] sm:$0xff] }
 0x1ae   : > { %3195 = vmatprep.subr.bf16.mxu1 %v3970_v22  ;;  %v2166_v47 = vld [vmem:[%s4563_s14] sm:$0xff] }
 0x1af   : > { %1517 = vmatmul.mubr.f32.gmra.mrb[12].mxu0 %v2396_v56 }
 0x1b0   : > { %3113 = vmatpush3.bf16.msk.msra.mxu0 %vm4052_vm4, %v3108_v25 }
 0x1b1   : > { %3147 = vmatprep.subr.bf16.mxu0 %v3631_v52  ;;  %3197 = vmatpush3.bf16.msra.mxu1 %v3985_v33  ;;  %v2413_v52 = vld [vmem:[%s3579_s20 + $0xf8] sm:$0xff] }
 0x1b2   : > { %3199 = vmatprep.subr.bf16.mxu1 %v3988_v37  ;;  %1697 = vmatprep.mubr.f32.mxu1 %v2413_v52 }
 0x1b3   : > { %1698 = vmatmul.mubr.f32.gmra.mrb[14].mxu1 %v2412_v34  ;;  %v1958_v34 = vld [vmem:[%s4559_s10 + $0x10] sm:$0xff] }
 0x1b4   : > { %1842 = vmatprep.mubr.f32.mxu1 %v2411_v36  ;;  %v1959_v36 = vld [vmem:[%s4559_s10 + $0x18] sm:$0xff] }
 0x1b5   : > { %3201 = vmatpush3.bf16.msra.mxu1 %v4003_v50 }
 0x1b6   : > { %3203 = vmatprep.subr.bf16.mxu1 %v4006_v55 }
 0x1b9   : > { %3205 = vmatpush3.bf16.msra.mxu1 %v4021_v0 }
 0x1ba   : > { %3207 = vmatprep.subr.bf16.mxu1 %v4024_v3 }
 0x1bd   : > { %3209 = vmatpush3.bf16.msra.mxu1 %v4033_v13 }
 0x1c0   : > { %1843 = vmatmul.mubr.f32.vlgmr.msra.gmra.mrb[16].mxu1 %v2410_v49 }
 0x1c1   : > { %1847 = vmatprep.mubr.f32.mxu1 %v2417_v54 }
 0x1c4   : > { %1848 = vmatmul.mubr.f32.gmra.mrb[18].mxu1 %v2416_v5  ;;  %v3224_v5 = vpack.c.bf16 %v1959_v36, %v1958_v34  ;;  %v2433_v36 = vld [vmem:[%s4564_s15] ss:$0 sm:$0xff] }
 0x25e   : > { %v2593_v8 = vpop.f32.mrb[6].mxu0 }
 0x25f   : > { %v2594_v22 = vpop.f32.mrb[7].mxu0 }
 0x260   : > { %v2595_v33 = vadd.f32 %v2594_v22, %v2593_v8  ;;  %v1961_v8 = vld [vmem:[%s4559_s10 + $0x28] sm:$0xff]  ;;  %v1962_v22 = vld [vmem:[%s4559_s10 + $0x30] sm:$0xff] }
 0x262   : > { %v1364_v37 = vadd.f32 %v2595_v33, %v2398_v21  ;;  %v2596_v50 = vpop.f32.mrb[8].mxu0  ;;  %v1963_v33 = vld [vmem:[%s4559_s10 + $0x38] sm:$0xff] }
 0x263   : > { %v2597_v55 = vpop.f32.mrb[9].mxu0 }
 0x264   : > { %v1439_v0 = vadd.f32 %v2633_v20, %v1364_v37  ;;  %v2598_v3 = vadd.f32 %v2597_v55, %v2596_v50  ;;  %v1957_v20 = vld [vmem:[%s4559_s10 + $0x8] sm:$0xff]  ;;  %v3232_v37 = vpack.c.bf16 %v1963_v33, %v1962_v22  ;;  %v2378_v50 = vld [vmem:[%s4558_s9] ss:$0 sm:$0xff] }
 0x265   : > { %v3220_v29 = vpack.c.bf16 %v1957_v20, %v1956_v17  ;;  %v2169_v17 = vld [vmem:[%s4563_s14 + $0x18] sm:$0xff] }
 0x266   : > { %v1369_v13 = vadd.f32 %v2598_v3, %v2398_v21 }
 0x268   : > { %v1444_v31 = vadd.f32 %v2636_v42, %v1369_v13  ;;  %v1951_v13 = vstv %s1946_s29  ;;  %s2428_s29 = sld [smem:[#allocation2 + $0x1]] }
 0x27e   : > { %v2669_v40 = vpop.f32.mrb[10].mxu0 }
 0x27f   : > { %v2670_v41 = vpop.f32.mrb[11].mxu0 }
 0x280   : > { %v2671_v45 = vadd.f32 %v2670_v41, %v2669_v40 }
 0x282   : > { %v1514_v58 = vadd.f32 %v2671_v45, %v1439_v0  ;;  %v2672_v59 = vpop.f32.mrb[12].mxu0 }
 0x283   : > { %v2673_v62 = vpop.f32.mrb[13].mxu0 }
 0x284   : > { %v1522_v63 = vmax.f32 %v1514_v58, 0.0  ;;  %v2674_v9 = vadd.f32 %v2673_v62, %v2672_v59 }
 0x286   : > { %v1519_v12 = vadd.f32 %v2674_v9, %v1444_v31  ;;  %2847 = vmatprep.mubr.msk.f32.mxu0 %vm1093_vm5, %v1522_v63 }
 0x288   : > { %v1523_v16 = vmax.f32 %v1519_v12, 0.0  ;;  %v2063_v12 = vld [vmem:[%s4561_s12] sm:$0xff] }
 0x28a   : > { %2848 = vmatmul.mubr.msk.f32.vlgmr.msra.gmra.mrb[0].mxu0 %vm1093_vm5, %v1523_v16  ;;  %v2064_v16 = vld [vmem:[%s4561_s12 + $0x8] sm:$0xff] }
 0x28b   : > { %3149 = vmatpush3.bf16.msra.mxu0 %v3661_v60  ;;  %1767 = vmatprep.mubr.f32.mxu0 %v2409_v18  ;;  %v2408_v60 = vld [vmem:[%s3579_s20 + $0xd0] sm:$0xff]  ;;  %v3236_v18 = vpack.c.bf16 %v2064_v16, %v2063_v12 }
 0x28c   : > { %3151 = vmatprep.subr.bf16.mxu0 %v3672_v2  ;;  %v2415_v2 = vld [vmem:[%s3579_s20 + $0x108] sm:$0xff] }
 0x28d   : > { %3237 = vmatprep.subr.bf16.mxu1 %v3236_v18 }
 0x28e   : > { %3239 = vmatpush3.bf16.msra.mxu1 %v3236_v18 }
 0x28f   : > { %3153 = vmatpush3.bf16.msra.mxu0 %v3701_v11  ;;  %v2414_v11 = vld [vmem:[%s3579_s20 + $0x100] sm:$0xff] }
 0x290   : > { %3155 = vmatprep.subr.bf16.mxu0 %v3710_v14  ;;  %v2713_v14 = vpop.f32.mrb[12].mxu1 }
 0x293   : > { %3157 = vmatpush3.bf16.msra.mxu0 %v3737_v23  ;;  %v2714_v23 = vpop.f32.mrb[13].mxu1 }
 0x294   : > { %3159 = vmatprep.subr.bf16.mxu0 %v3746_v26  ;;  %v2715_v26 = vadd.f32 %v2714_v23, %v2713_v14  ;;  %v2425_v14 = vld [vmem:[%s4560_s11] ss:$0 sm:$0xff] }
 0x296   : > { %v1695_v46 = vadd.f32 %v2715_v26, %v4186_v7 }
 0x297   : > { %3161 = vmatpush3.bf16.msra.mxu0 %v3773_v35  ;;  %v2716_v35 = vpop.f32.mrb[14].mxu1 }
 0x298   : > { %3163 = vmatprep.subr.bf16.mxu0 %v3782_v38  ;;  %v2717_v38 = vpop.f32.mrb[15].mxu1 }
 0x29b   : > { %3165 = vmatpush3.bf16.msra.mxu0 %v3810_v53  ;;  %v2718_v53 = vadd.f32 %v2717_v38, %v2716_v35  ;;  %v2058_v38 = vstv %s2428_s29  ;;  %s2432_s29 = sld [smem:[#allocation2 + $0x2]] }
 0x29c   : > { %3167 = vmatprep.subr.bf16.mxu0 %v3819_v57  ;;  %v2789_v57 = vpop.f32.mrb[16].mxu1 }
 0x29d   : > { %v1700_v48 = vadd.f32 %v2718_v53, %v4186_v7  ;;  %v1960_v7 = vld [vmem:[%s4559_s10 + $0x20] sm:$0xff] }
 0x29e   : > { %v3228_v21 = vpack.c.bf16 %v1961_v8, %v1960_v7 }
 0x29f   : > { %3169 = vmatpush3.bf16.msra.mxu0 %v3847_v6  ;;  %v2790_v6 = vpop.f32.mrb[17].mxu1 }
 0x2a0   : > { %3171 = vmatprep.subr.bf16.mxu0 %v3856_v10  ;;  %v2418_v10 = vld [vmem:[%s4557_s8 + $0x40] sm:$0xff]  ;;  %v2792_v39 = vpop.f32.mrb[18].mxu1 }
 0x2a1   : > { %v2793_v43 = vpop.f32.mrb[19].mxu1 }
 0x2a2   : > { %v2794_v56 = vadd.f32 %v2793_v43, %v2792_v39 }
 0x2a3   : > { %3173 = vmatpush3.bf16.msra.mxu0 %v3883_v24  ;;  %v2419_v24 = vld [vmem:[%s4557_s8 + $0x48] sm:$0xff] }
 0x2a4   : > { %3175 = vmatprep.subr.bf16.mxu0 %v3892_v28  ;;  %v2791_v28 = vadd.f32 %v2790_v6, %v2789_v57 }
 0x2a7   : > { %3177 = vmatpush3.bf16.msra.mxu0 %v3915_v44  ;;  %v3210_v44 = vpack.c.bf16 %v2419_v24, %v2418_v10 }
 0x2a9   : > { %3211 = vmatprep.subr.bf16.mxu0 %v3210_v44 }
 0x2aa   : > { %1768 = vmatmul.mubr.f32.vlgmr.msra.gmra.mrb[14].mxu0 %v2408_v60  ;;  %v2065_v60 = vld [vmem:[%s4561_s12 + $0x10] sm:$0xff] }
 0x2ab   : > { %1772 = vmatprep.mubr.f32.mxu0 %v2415_v2  ;;  %3213 = vmatpush3.bf16.msra.mxu0 %v3210_v44  ;;  %v2066_v2 = vld [vmem:[%s4561_s12 + $0x18] sm:$0xff] }
 0x2ac   : > { %3216 = vmatprep.subr.msk.bf16.mxu0 %vm4052_vm4, %v3214_v4 }
 0x2ae   : > { %1773 = vmatmul.mubr.f32.gmra.mrb[16].mxu0 %v2414_v11  ;;  %v3240_v11 = vpack.c.bf16 %v2066_v2, %v2065_v60 }
 0x2af   : > { %3219 = vmatpush3.bf16.msk.msra.mxu0 %vm4052_vm4, %v3214_v4  ;;  %v2168_v4 = vld [vmem:[%s4563_s14 + $0x10] sm:$0xff] }
 0x2b0   : > { %3221 = vmatprep.subr.bf16.mxu0 %v3220_v29  ;;  %3241 = vmatprep.subr.bf16.mxu1 %v3240_v11  ;;  %v3248_v20 = vpack.c.bf16 %v2169_v17, %v2168_v4 }
 0x2b1   : > { %3243 = vmatpush3.bf16.msra.mxu1 %v3240_v11 }
 0x37d   : > { %v2751_v32 = vpop.f32.mrb[14].mxu0 }
 0x37e   : > { %v2752_v42 = vpop.f32.mrb[15].mxu0 }
 0x37f   : > { %v2753_v61 = vadd.f32 %v2752_v42, %v2751_v32 }
 0x381   : > { %v1770_v1 = vadd.f32 %v2753_v61, %v1695_v46  ;;  %v2754_v15 = vpop.f32.mrb[16].mxu0  ;;  %v2161_v61 = vstv %s2432_s29 }
 0x382   : > { %v2755_v19 = vpop.f32.mrb[17].mxu0 }
 0x383   : > { %v1845_v25 = vadd.f32 %v2791_v28, %v1770_v1  ;;  %v2756_v27 = vadd.f32 %v2755_v19, %v2754_v15 }
 0x385   : > { %v1853_v30 = vmax.f32 %v1845_v25, 0.0  ;;  %v1775_v52 = vadd.f32 %v2756_v27, %v1700_v48 }
 0x387   : > { %v1850_v49 = vadd.f32 %v2794_v56, %v1775_v52  ;;  %2858 = vmatprep.mubr.msk.f32.mxu0 %vm1093_vm5, %v1853_v30  ;;  %v3244_v56 = vpack.c.bf16 %v2167_v51, %v2166_v47 }
 0x389   : > { %v1854_v54 = vmax.f32 %v1850_v49, 0.0  ;;  %3245 = vmatprep.subr.bf16.mxu1 %v3244_v56 }
 0x38b   : > { %2859 = vmatmul.mubr.msk.f32.vlgmr.msra.gmra.mrb[0].mxu0 %vm1093_vm5, %v1854_v54 }
 0x38c   : > { %3223 = vmatpush3.bf16.msra.mxu0 %v3220_v29  ;;  %v2429_v29 = vld [vmem:[%s4562_s13] ss:$0 sm:$0xff] }
 0x38d   : > { %3225 = vmatprep.subr.bf16.mxu0 %v3224_v5 }
 0x390   : > { %3227 = vmatpush3.bf16.msra.mxu0 %v3224_v5 }
 0x391   : > { %3229 = vmatprep.subr.bf16.mxu0 %v3228_v21 }
 0x394   : > { %3231 = vmatpush3.bf16.msra.mxu0 %v3228_v21 }
 0x395   : > { %3233 = vmatprep.subr.bf16.mxu0 %v3232_v37 }
 0x398   : > { %3235 = vmatpush3.bf16.msra.mxu0 %v3232_v37 }
 0x45e   : > { %v2860_v55 = vpop.f32.mrb[0].mxu0 }
 0x45f   : > { %v3252_v0 = vadd.f32 %v2860_v55, %v2378_v50  ;;  %v1935_v3 = vpop.f32.mrb[1].mxu0 }
 0x460   : > { %v3253_v31 = vadd.f32 %v2378_v50, %v1935_v3 }
 0x461   : > { %v1950_v40 = vmin.f32 %v3252_v0, 0.0  ;;  %v1948_v62 = vmax.f32 %v3252_v0, 0.0 }
 0x462   : > { %v1949_v41 = vmin.f32 %v3253_v31, 0.0  ;;  %v1947_v58 = vmax.f32 %v3253_v31, 0.0 }
 0x463   : > { %v1953_v45 = vmul.f32 %v1951_v13, %v1950_v40 }
 0x464   : > { %v1952_v59 = vmul.f32 %v1951_v13, %v1949_v41 }
 0x465   : > { %v1955_v9 = vadd.f32 %v1953_v45, %v1948_v62 }
 0x466   : > { %v1954_v63 = vadd.f32 %v1952_v59, %v1947_v58 }
 0x468   : > { %2877 = vmatprep.mubr.msk.f32.mxu0 %vm1971_vm6, %v1954_v63 }
 0x469   : > { %2878 = vmatmul.mubr.msk.f32.vlgmr.msra.gmra.mrb[18].mxu0 %vm1971_vm6, %v1955_v9 }
 0x53c   : > { %v2879_v23 = vpop.f32.mrb[18].mxu0 }
 0x53d   : > { %v2050_v26 = vadd.f32 %v2879_v23, %v2425_v14  ;;  %v2044_v35 = vpop.f32.mrb[19].mxu0 }
 0x53e   : > { %v2045_v53 = vadd.f32 %v2425_v14, %v2044_v35 }
 0x53f   : > { %v2057_v57 = vmin.f32 %v2050_v26, 0.0  ;;  %v2055_v44 = vmax.f32 %v2050_v26, 0.0 }
 0x540   : > { %v2056_v6 = vmin.f32 %v2045_v53, 0.0  ;;  %v2054_v24 = vmax.f32 %v2045_v53, 0.0 }
 0x541   : > { %v2060_v10 = vmul.f32 %v2058_v38, %v2057_v57 }
 0x542   : > { %v2059_v28 = vmul.f32 %v2058_v38, %v2056_v6 }
 0x543   : > { %v2062_v43 = vadd.f32 %v2060_v10, %v2055_v44 }
 0x544   : > { %v2061_v39 = vadd.f32 %v2059_v28, %v2054_v24 }
 0x546   : > { %2888 = vmatprep.mubr.msk.f32.mxu1 %vm2074_vm7, %v2061_v39 }
 0x547   : > { %2889 = vmatmul.mubr.msk.f32.vlgmr.msra.gmra.mrb[20].mxu1 %vm2074_vm7, %v2062_v43 }
 0x548   : > { %3247 = vmatpush3.bf16.msra.mxu1 %v3244_v56 }
 0x549   : > { %3249 = vmatprep.subr.bf16.mxu1 %v3248_v20 }
 0x54c   : > { %3251 = vmatpush3.bf16.msra.mxu1 %v3248_v20 }
 0x61a   : > { %v2890_v32 = vpop.f32.mrb[20].mxu1 }
 0x61b   : > { %v2153_v42 = vadd.f32 %v2890_v32, %v2429_v29  ;;  %v2147_v46 = vpop.f32.mrb[21].mxu1 }
 0x61c   : > { %v2148_v1 = vadd.f32 %v2429_v29, %v2147_v46 }
 0x61d   : > { %v2160_v15 = vmin.f32 %v2153_v42, 0.0  ;;  %v2158_v30 = vmax.f32 %v2153_v42, 0.0 }
 0x61e   : > { %v2159_v19 = vmin.f32 %v2148_v1, 0.0  ;;  %v2157_v25 = vmax.f32 %v2148_v1, 0.0 }
 0x61f   : > { %v2163_v48 = vmul.f32 %v2161_v61, %v2160_v15 }
 0x620   : > { %v2162_v27 = vmul.f32 %v2161_v61, %v2159_v19 }
 0x621   : > { %v2165_v34 = vadd.f32 %v2163_v48, %v2158_v30 }
 0x622   : > { %v2164_v52 = vadd.f32 %v2162_v27, %v2157_v25 }
 0x624   : > { %2899 = vmatprep.mubr.msk.f32.mxu1 %vm2074_vm7, %v2164_v52 }
 0x625   : > { %2900 = vmatmul.mubr.msk.f32.vlgmr.msra.gmra.mrb[22].mxu1 %vm2074_vm7, %v2165_v34 }
 0x6f8   : > { %v2901_v49 = vpop.f32.mrb[22].mxu1 }
 0x6f9   : > { %v2249_v54 = vpop.f32.mrb[23].mxu1  ;;  %v2255_v7 = vadd.f32 %v2901_v49, %v2433_v36 }
 0x6fa   : > { %v2250_v5 = vadd.f32 %v2433_v36, %v2249_v54 }
 0x6fc   : > { %2258 = vmax.xlane.f32.xlu0 %v2250_v5 }
 0x700   : > { %2260 = vmax.xlane.f32.xlu0 %v2255_v7 }
 0x789   : > { %v2259_v8 = vpop.xlane.xlu0 %2258 }
 0x78a   : > { %v2262_v21 = vsub.f32 %v2250_v5, %v2259_v8 }
 0x78c   : > { %v2264_v22 = vmul.f32 1.442695, %v2262_v21 }
 0x78d   : > { %v2261_v33 = vpop.xlane.xlu0 %2260 }
 0x78e   : > { %3299 = vpow2.f32 %v2264_v22  ;;  %v2263_v37 = vsub.f32 %v2255_v7, %v2261_v33 }
 0x790   : > { %v2266_v50 = vmul.f32 1.442695, %v2263_v37 }
 0x792   : > { %3301 = vpow2.f32 %v2266_v50 }
 0x798   : > { %v3300_v55 = vpop.eup %3299 }
 0x799   : > { %2268 = vadd.xlane.f32.xlu1 %v3300_v55 }
 0x79c   : > { %v3302_v0 = vpop.eup %3301 }
 0x79d   : > { %2270 = vadd.xlane.f32.xlu1 %v3302_v0 }
 0x826   : > { %v2269_v3 = vpop.xlane.xlu1 %2268 }
 0x827   : > { %3303 = vrcp.f32 %v2269_v3 }
 0x82a   : > { %v2271_v13 = vpop.xlane.xlu1 %2270 }
 0x82b   : > { %3305 = vrcp.f32 %v2271_v13 }
 0x831   : > { %v3304_v31 = vpop.eup %3303 }
 0x832   : > { %v2273_v40 = vmul.f32 %v3304_v31, %v3300_v55 }
 0x834   : > { %2276 = vst [vmem:[%s649_s30] sm:$0xff] %v2273_v40 }
 0x835   : > { %v3306_v41 = vpop.eup %3305 }
 0x836   : > { %v2275_v45 = vmul.f32 %v3306_v41, %v3302_v0 }
 0x838   : > { %2277 = vst [vmem:[%s649_s30 + $0x8] sm:$0xff] %v2275_v45 }
 0x839 PF: > { %s4576_s24 = sld [smem:[#allocation6_spill]]  ;;  %p24_p6 = scmp.ge.s32.totalorder %s3454_s25, 4  }
 0x83a   : > { %s4577_s21 = smov %s3344_s22  ;;  %s4579_s23 = smov %s3454_s25 }
 0x83b   :  { %26 = sbr.rel (!%p24_p6) target bundleno = 4 (0x4), region = 154 }
 0x83f   : > { %s4578_s22 = smov %s4576_s24 }
 0x842   :  { %2300 = vsyncpa [#allocation3], 1 }
 0x843   :  { %2302 = vsyncpa [#allocation3 + $0x1], 1 }

</bundles_post_ra>
